<compile_context>
chip_gen: v7x
topology: tpu7x:2x2x1
jax: 0.10.0
libtpu: 0.0.40
codegen_flags: <defaults>
</compile_context>

<pallas_src>
import numpy as np
import jax
import jax.numpy as jnp
from jax import lax
from jax.experimental import pallas as pl
from jax.experimental.pallas import tpu as pltpu

EMB = 128          # hard-coded emb channels (nn.Conv2d(720, 128, 1, 1))
CI = 64            # NLBlockND inter_channels = in_channels // 2
CI_PAD = 128       # inter channels zero-padded to a full lane width
BN_EPS = 1e-5


def _round_up(x, m):
    return (x + m - 1) // m * m


# ----------------------------------------------------------------------------
# Fused Pallas kernel: one batch element per grid step.
# ----------------------------------------------------------------------------
def _non_local_kernel(x_ref, we_ref, be_ref, wtpg_ref, btpg_ref,
                      wwz_ref, sz_ref, bz_ref, wl_ref, bl_ref, o_ref):
    # x   : (1, THW, CIN_PAD)  bf16   channels-last, positions = T*H*W
    # we  : (CIN_PAD, 128) bf16, be  : (1, 128) f32        emb 1x1 conv
    # wtpg: (128, 384)     bf16, btpg: (1, 384) f32        theta|phi|g fused
    # wwz : (128, 128)     bf16, sz/bz: (1, 128) f32       W_z conv + folded BN
    # wl  : (128, NC_PAD)  bf16, bl  : (1, NC_PAD) f32     last_layer
    # o   : (1, THW, NC_PAD) f32
    n_pos = x_ref.shape[1]                         # static: T*H*W (un-padded)

    # 1) emb: 1x1 conv 720 -> 128 (+bias), f32 accumulation on the MXU.
    xe = jnp.dot(x_ref[0], we_ref[...],
                 preferred_element_type=jnp.float32) + be_ref[...]

    # 2) theta / phi / g projections (1x1x1 Conv3d 128 -> 64, padded to 128).
    proj = jnp.dot(xe.astype(jnp.bfloat16), wtpg_ref[...],
                   preferred_element_type=jnp.float32) + btpg_ref[...]
    proj = proj.astype(jnp.bfloat16)
    theta = proj[:, 0:CI_PAD]
    phi = proj[:, CI_PAD:2 * CI_PAD]
    g = proj[:, 2 * CI_PAD:3 * CI_PAD]

    # 3) non-local 'dot' aggregation, reassociated:
    #      y = (theta @ phi^T / N) @ g  ==  theta @ (phi^T @ g) / N
    #    -> never builds the (THW, THW) similarity matrix.
    pg = lax.dot_general(phi, g, (((0,), (0,)), ((), ())),
                         preferred_element_type=jnp.float32)   # (CI_PAD, CI_PAD)
    y = jnp.dot(theta, pg.astype(jnp.bfloat16),
                preferred_element_type=jnp.float32) * (1.0 / n_pos)

    # 4) W_z (1x1x1 conv 64 -> 128) + inference BatchNorm (folded) + residual.
    wy = jnp.dot(y.astype(jnp.bfloat16), wwz_ref[...],
                 preferred_element_type=jnp.float32)
    z = wy * sz_ref[...] + bz_ref[...] + xe

    # 5) last_layer: 1x1 conv 128 -> num_class (lane-padded to NC_PAD).
    out = jnp.dot(z.astype(jnp.bfloat16), wl_ref[...],
                  preferred_element_type=jnp.float32) + bl_ref[...]
    o_ref[0] = out.astype(o_ref.dtype)


# ----------------------------------------------------------------------------
# pallas_call wrapper (full Non_local forward)
# ----------------------------------------------------------------------------
def non_local_forward(clip_imgs, params):
    """clip_imgs: list of T arrays (B, C_in, H, W) NCHW.
    Returns list of T arrays (B, num_class, H, W), matching the PyTorch forward."""
    T = len(clip_imgs)
    B, C, H, W = clip_imgs[0].shape
    THW = T * H * W
    cin_pad = params["W_emb"].shape[0]
    tpg_w = params["W_tpg"].shape[1]
    nc_pad = params["W_last"].shape[1]
    nc = params["num_class"]

    # NCHW clips -> (B, T*H*W, C) channels-last, T slowest (matches the
    # PyTorch cat(dim=2) + view(B, C, -1) position ordering); pad C to lanes.
    x = jnp.stack(clip_imgs, axis=0)                    # (T, B, C, H, W)
    x = jnp.transpose(x, (1, 0, 3, 4, 2))               # (B, T, H, W, C)
    x = x.reshape(B, THW, C)
    x = jnp.pad(x, ((0, 0), (0, 0), (0, cin_pad - C))).astype(jnp.bfloat16)

    flops = 2 * B * THW * (cin_pad * EMB + EMB * tpg_w + 2 * CI_PAD * CI_PAD
                           + CI_PAD * EMB + EMB * nc_pad)
    bytes_accessed = (int(x.size) * 2 + B * THW * nc_pad * 4
                      + B * (cin_pad * EMB + EMB * tpg_w + CI_PAD * EMB
                             + EMB * nc_pad) * 2)

    out = pl.pallas_call(
        _non_local_kernel,
        out_shape=jax.ShapeDtypeStruct((B, THW, nc_pad), jnp.float32),
        grid=(B,),
        in_specs=[
            pl.BlockSpec((1, THW, cin_pad), lambda b: (b, 0, 0)),
            pl.BlockSpec((cin_pad, EMB), lambda b: (0, 0)),
            pl.BlockSpec((1, EMB), lambda b: (0, 0)),
            pl.BlockSpec((EMB, tpg_w), lambda b: (0, 0)),
            pl.BlockSpec((1, tpg_w), lambda b: (0, 0)),
            pl.BlockSpec((CI_PAD, EMB), lambda b: (0, 0)),
            pl.BlockSpec((1, EMB), lambda b: (0, 0)),
            pl.BlockSpec((1, EMB), lambda b: (0, 0)),
            pl.BlockSpec((EMB, nc_pad), lambda b: (0, 0)),
            pl.BlockSpec((1, nc_pad), lambda b: (0, 0)),
        ],
        out_specs=pl.BlockSpec((1, THW, nc_pad), lambda b: (b, 0, 0)),
        compiler_params=pltpu.CompilerParams(
            dimension_semantics=("parallel",)),
        cost_estimate=pl.CostEstimate(flops=flops, transcendentals=0,
                                      bytes_accessed=bytes_accessed),
    )(x, params["W_emb"], params["b_emb"], params["W_tpg"], params["b_tpg"],
      params["W_wz"], params["wz_scale"], params["wz_bias"],
      params["W_last"], params["b_last"])

    out = out[..., :nc].reshape(B, T, H, W, nc)
    out = jnp.transpose(out, (1, 0, 4, 2, 3))           # (T, B, nc, H, W)
    return [out[t] for t in range(T)]


# ----------------------------------------------------------------------------
# Pure-JAX reference (follows the PyTorch op order: builds the full THWxTHW
# similarity matrix), with bf16 matmul operands / f32 accumulation to mirror
# the kernel's precision policy.
# ----------------------------------------------------------------------------
def reference_forward(clip_imgs, params):
    T = len(clip_imgs)
    B, C, H, W = clip_imgs[0].shape
    THW = T * H * W
    cin_pad = params["W_emb"].shape[0]
    nc = params["num_class"]

    x = jnp.stack(clip_imgs, axis=0)
    x = jnp.transpose(x, (1, 0, 3, 4, 2)).reshape(B, THW, C)
    x = jnp.pad(x, ((0, 0), (0, 0), (0, cin_pad - C))).astype(jnp.bfloat16)

    def bdot(a, w):
        return jnp.dot(a.astype(jnp.bfloat16), w,
                       preferred_element_type=jnp.float32)

    xe = bdot(x, params["W_emb"]) + params["b_emb"]            # emb
    proj = bdot(xe, params["W_tpg"]) + params["b_tpg"]         # theta|phi|g
    proj = proj.astype(jnp.bfloat16)
    theta = proj[..., 0:CI_PAD]
    phi = proj[..., CI_PAD:2 * CI_PAD]
    g = proj[..., 2 * CI_PAD:3 * CI_PAD]

    f = jnp.einsum("bnc,bmc->bnm", theta, phi,
                   preferred_element_type=jnp.float32) / THW   # 'dot' mode
    y = jnp.einsum("bnm,bmc->bnc", f.astype(jnp.bfloat16), g,
                   preferred_element_type=jnp.float32)

    wy = bdot(y, params["W_wz"])
    z = wy * params["wz_scale"] + params["wz_bias"] + xe       # W_z + BN + res
    out = bdot(z, params["W_last"]) + params["b_last"]         # last_layer

    out = out[..., :nc].reshape(B, T, H, W, nc)
    out = jnp.transpose(out, (1, 0, 4, 2, 3))
    return [out[t] for t in range(T)]


# ----------------------------------------------------------------------------
# Parameter init (random weights; PyTorch-equivalent shapes, lane-padded)
# ----------------------------------------------------------------------------
def init_params(key, c_in, num_class):
    cin_pad = _round_up(c_in, 128)
    nc_pad = _round_up(num_class, 128)
    ks = jax.random.split(key, 16)
    p = {"num_class": num_class}

    # emb: Conv2d(c_in, 128, 1) with bias
    w = jax.random.normal(ks[0], (c_in, EMB), jnp.float32) / np.sqrt(c_in)
    p["W_emb"] = jnp.pad(w, ((0, cin_pad - c_in), (0, 0))).astype(jnp.bfloat16)
    p["b_emb"] = 0.1 * jax.random.normal(ks[1], (1, EMB), jnp.float32)

    # theta / phi / g: Conv3d(128, 64, 1) with bias; padded to 128 and fused
    wt, bt = [], []
    for i in range(3):
        w = jax.random.normal(ks[2 + 2 * i], (EMB, CI), jnp.float32) / np.sqrt(EMB)
        b = 0.1 * jax.random.normal(ks[3 + 2 * i], (1, CI), jnp.float32)
        wt.append(jnp.pad(w, ((0, 0), (0, CI_PAD - CI))))
        bt.append(jnp.pad(b, ((0, 0), (0, CI_PAD - CI))))
    p["W_tpg"] = jnp.concatenate(wt, axis=1).astype(jnp.bfloat16)   # (128, 384)
    p["b_tpg"] = jnp.concatenate(bt, axis=1)                        # (1, 384)

    # W_z: Conv3d(64, 128, 1) + BatchNorm3d(128), folded to scale/bias
    w = jax.random.normal(ks[8], (CI, EMB), jnp.float32) / np.sqrt(CI)
    p["W_wz"] = jnp.pad(w, ((0, CI_PAD - CI), (0, 0))).astype(jnp.bfloat16)
    b_conv = 0.1 * jax.random.normal(ks[9], (1, EMB), jnp.float32)
    gamma = 1.0 + 0.1 * jax.random.normal(ks[10], (1, EMB), jnp.float32)
    beta = 0.1 * jax.random.normal(ks[11], (1, EMB), jnp.float32)
    mean = 0.1 * jax.random.normal(ks[12], (1, EMB), jnp.float32)
    var = jax.random.uniform(ks[13], (1, EMB), jnp.float32, minval=0.5, maxval=1.5)
    scale = gamma * lax.rsqrt(var + BN_EPS)
    p["wz_scale"] = scale
    p["wz_bias"] = (b_conv - mean) * scale + beta

    # last_layer: Conv2d(128, num_class, 1) with bias, lane-padded
    w = jax.random.normal(ks[14], (EMB, num_class), jnp.float32) / np.sqrt(EMB)
    p["W_last"] = jnp.pad(w, ((0, 0), (0, nc_pad - num_class))).astype(jnp.bfloat16)
    b = 0.1 * jax.random.normal(ks[15], (1, num_class), jnp.float32)
    p["b_last"] = jnp.pad(b, ((0, 0), (0, nc_pad - num_class)))
    return p


if __name__ == "__main__":
    # SMALL test shapes: clip_num (T)=2, batch=2, 8x8 spatial, the module's
    # hard-coded 720 input channels, num_class=16.
    T, B, H, W = 2, 2, 8, 8
    C_IN, NUM_CLASS = 720, 16

    key = jax.random.PRNGKey(0)
    kx, kp = jax.random.split(key)
    clip_imgs = [jax.random.normal(k, (B, C_IN, H, W), jnp.float32)
                 for k in jax.random.split(kx, T)]
    params = init_params(kp, C_IN, NUM_CLASS)

    outs = non_local_forward(clip_imgs, params)          # list of T tensors
    outs = jax.block_until_ready(jnp.stack(outs))        # (T, B, nc, H, W)
    assert outs.shape == (T, B, NUM_CLASS, H, W), outs.shape

    refs = jax.block_until_ready(jnp.stack(reference_forward(clip_imgs, params)))
    # Tolerance reflects bf16 MXU operands + the exact-in-infinite-precision
    # reassociation of the 'dot' aggregation.
    np.testing.assert_allclose(np.asarray(outs), np.asarray(refs),
                               rtol=5e-2, atol=5e-2)
    print("KERNEL_OK")
</pallas_src>

<mosaic_0001>
module attributes {stable_mosaic.version = 11 : i64} {
  func.func @_non_local_kernel(%arg0: i32, %arg1: memref<1x128x768xbf16, #tpu.memory_space<vmem>>, %arg2: memref<768x128xbf16, #tpu.memory_space<vmem>>, %arg3: memref<1x128xf32, #tpu.memory_space<vmem>>, %arg4: memref<128x384xbf16, #tpu.memory_space<vmem>>, %arg5: memref<1x384xf32, #tpu.memory_space<vmem>>, %arg6: memref<128x128xbf16, #tpu.memory_space<vmem>>, %arg7: memref<1x128xf32, #tpu.memory_space<vmem>>, %arg8: memref<1x128xf32, #tpu.memory_space<vmem>>, %arg9: memref<128x128xbf16, #tpu.memory_space<vmem>>, %arg10: memref<1x128xf32, #tpu.memory_space<vmem>>, %arg11: memref<1x128x128xf32, #tpu.memory_space<vmem>>) attributes {dimension_semantics = [#tpu.dimension_semantics<parallel>], iteration_bounds = array<i64: 2>, scalar_prefetch = 0 : i64, scratch_operands = 0 : i64, tpu.core_type = #tpu.core_type<tc>, window_params = [{transform_indices = @transform_0, window_bounds = array<i64: 1, 128, 768>}, {pipeline_mode = #tpu.pipeline_mode<synchronous>, transform_indices = @transform_1, window_bounds = array<i64: 768, 128>}, {pipeline_mode = #tpu.pipeline_mode<synchronous>, transform_indices = @transform_2, window_bounds = array<i64: 1, 128>}, {pipeline_mode = #tpu.pipeline_mode<synchronous>, transform_indices = @transform_3, window_bounds = array<i64: 128, 384>}, {pipeline_mode = #tpu.pipeline_mode<synchronous>, transform_indices = @transform_4, window_bounds = array<i64: 1, 384>}, {pipeline_mode = #tpu.pipeline_mode<synchronous>, transform_indices = @transform_5, window_bounds = array<i64: 128, 128>}, {pipeline_mode = #tpu.pipeline_mode<synchronous>, transform_indices = @transform_6, window_bounds = array<i64: 1, 128>}, {pipeline_mode = #tpu.pipeline_mode<synchronous>, transform_indices = @transform_7, window_bounds = array<i64: 1, 128>}, {pipeline_mode = #tpu.pipeline_mode<synchronous>, transform_indices = @transform_8, window_bounds = array<i64: 128, 128>}, {pipeline_mode = #tpu.pipeline_mode<synchronous>, transform_indices = @transform_9, window_bounds = array<i64: 1, 128>}, {transform_indices = @transform_10, window_bounds = array<i64: 1, 128, 128>}]} {
    %c0 = arith.constant 0 : index
    %c0_0 = arith.constant 0 : index
    %c0_1 = arith.constant 0 : index
    %0 = vector.load %arg1[%c0, %c0_0, %c0_1] : memref<1x128x768xbf16, #tpu.memory_space<vmem>>, vector<1x128x768xbf16>
    %1 = vector.shape_cast %0 : vector<1x128x768xbf16> to vector<128x768xbf16>
    %c0_2 = arith.constant 0 : index
    %c0_3 = arith.constant 0 : index
    %2 = vector.load %arg2[%c0_2, %c0_3] : memref<768x128xbf16, #tpu.memory_space<vmem>>, vector<768x128xbf16>
    %cst = arith.constant dense<0.000000e+00> : vector<128x128xf32>
    %3 = tpu.matmul %1, %2, %cst {dimension_numbers = #tpu.dot_dimension_numbers<[1], [0], [0], [1], [0, 0, 1, 1], [], []>} : vector<128x768xbf16>, vector<768x128xbf16>, vector<128x128xf32> -> vector<128x128xf32>
    %c0_4 = arith.constant 0 : index
    %c0_5 = arith.constant 0 : index
    %4 = vector.load %arg3[%c0_4, %c0_5] : memref<1x128xf32, #tpu.memory_space<vmem>>, vector<1x128xf32>
    %5 = vector.broadcast %4 : vector<1x128xf32> to vector<128x128xf32>
    %6 = arith.addf %3, %5 : vector<128x128xf32>
    %7 = arith.truncf %6 : vector<128x128xf32> to vector<128x128xbf16>
    %c0_6 = arith.constant 0 : index
    %c0_7 = arith.constant 0 : index
    %8 = vector.load %arg4[%c0_6, %c0_7] : memref<128x384xbf16, #tpu.memory_space<vmem>>, vector<128x384xbf16>
    %cst_8 = arith.constant dense<0.000000e+00> : vector<128x384xf32>
    %9 = tpu.matmul %7, %8, %cst_8 {dimension_numbers = #tpu.dot_dimension_numbers<[1], [0], [0], [1], [0, 0, 1, 1], [], []>} : vector<128x128xbf16>, vector<128x384xbf16>, vector<128x384xf32> -> vector<128x384xf32>
    %c0_9 = arith.constant 0 : index
    %c0_10 = arith.constant 0 : index
    %10 = vector.load %arg5[%c0_9, %c0_10] : memref<1x384xf32, #tpu.memory_space<vmem>>, vector<1x384xf32>
    %11 = vector.broadcast %10 : vector<1x384xf32> to vector<128x384xf32>
    %12 = arith.addf %9, %11 : vector<128x384xf32>
    %13 = arith.truncf %12 : vector<128x384xf32> to vector<128x384xbf16>
    %14 = vector.extract_strided_slice %13 {offsets = [0, 0], sizes = [128, 128], strides = [1, 1]} : vector<128x384xbf16> to vector<128x128xbf16>
    %15 = vector.extract_strided_slice %13 {offsets = [0, 128], sizes = [128, 128], strides = [1, 1]} : vector<128x384xbf16> to vector<128x128xbf16>
    %16 = vector.extract_strided_slice %13 {offsets = [0, 256], sizes = [128, 128], strides = [1, 1]} : vector<128x384xbf16> to vector<128x128xbf16>
    %cst_11 = arith.constant dense<0.000000e+00> : vector<128x128xf32>
    %17 = tpu.matmul %15, %16, %cst_11 {dimension_numbers = #tpu.dot_dimension_numbers<[0], [0], [1], [1], [0, 1, 1, 1], [], []>} : vector<128x128xbf16>, vector<128x128xbf16>, vector<128x128xf32> -> vector<128x128xf32>
    %18 = arith.truncf %17 : vector<128x128xf32> to vector<128x128xbf16>
    %cst_12 = arith.constant dense<0.000000e+00> : vector<128x128xf32>
    %19 = tpu.matmul %14, %18, %cst_12 {dimension_numbers = #tpu.dot_dimension_numbers<[1], [0], [0], [1], [0, 0, 1, 1], [], []>} : vector<128x128xbf16>, vector<128x128xbf16>, vector<128x128xf32> -> vector<128x128xf32>
    %cst_13 = arith.constant 7.812500e-03 : f32
    %20 = vector.broadcast %cst_13 : f32 to vector<128x128xf32>
    %21 = arith.mulf %19, %20 : vector<128x128xf32>
    %22 = arith.truncf %21 : vector<128x128xf32> to vector<128x128xbf16>
    %c0_14 = arith.constant 0 : index
    %c0_15 = arith.constant 0 : index
    %23 = vector.load %arg6[%c0_14, %c0_15] : memref<128x128xbf16, #tpu.memory_space<vmem>>, vector<128x128xbf16>
    %cst_16 = arith.constant dense<0.000000e+00> : vector<128x128xf32>
    %24 = tpu.matmul %22, %23, %cst_16 {dimension_numbers = #tpu.dot_dimension_numbers<[1], [0], [0], [1], [0, 0, 1, 1], [], []>} : vector<128x128xbf16>, vector<128x128xbf16>, vector<128x128xf32> -> vector<128x128xf32>
    %c0_17 = arith.constant 0 : index
    %c0_18 = arith.constant 0 : index
    %25 = vector.load %arg7[%c0_17, %c0_18] : memref<1x128xf32, #tpu.memory_space<vmem>>, vector<1x128xf32>
    %26 = vector.broadcast %25 : vector<1x128xf32> to vector<128x128xf32>
    %27 = arith.mulf %24, %26 : vector<128x128xf32>
    %c0_19 = arith.constant 0 : index
    %c0_20 = arith.constant 0 : index
    %28 = vector.load %arg8[%c0_19, %c0_20] : memref<1x128xf32, #tpu.memory_space<vmem>>, vector<1x128xf32>
    %29 = vector.broadcast %28 : vector<1x128xf32> to vector<128x128xf32>
    %30 = arith.addf %27, %29 : vector<128x128xf32>
    %31 = arith.addf %30, %6 : vector<128x128xf32>
    %32 = arith.truncf %31 : vector<128x128xf32> to vector<128x128xbf16>
    %c0_21 = arith.constant 0 : index
    %c0_22 = arith.constant 0 : index
    %33 = vector.load %arg9[%c0_21, %c0_22] : memref<128x128xbf16, #tpu.memory_space<vmem>>, vector<128x128xbf16>
    %cst_23 = arith.constant dense<0.000000e+00> : vector<128x128xf32>
    %34 = tpu.matmul %32, %33, %cst_23 {dimension_numbers = #tpu.dot_dimension_numbers<[1], [0], [0], [1], [0, 0, 1, 1], [], []>} : vector<128x128xbf16>, vector<128x128xbf16>, vector<128x128xf32> -> vector<128x128xf32>
    %c0_24 = arith.constant 0 : index
    %c0_25 = arith.constant 0 : index
    %35 = vector.load %arg10[%c0_24, %c0_25] : memref<1x128xf32, #tpu.memory_space<vmem>>, vector<1x128xf32>
    %36 = vector.broadcast %35 : vector<1x128xf32> to vector<128x128xf32>
    %37 = arith.addf %34, %36 : vector<128x128xf32>
    %c0_26 = arith.constant 0 : index
    %c0_27 = arith.constant 0 : index
    %c0_28 = arith.constant 0 : index
    %38 = vector.load %arg11[%c0_26, %c0_27, %c0_28] : memref<1x128x128xf32, #tpu.memory_space<vmem>>, vector<1x128x128xf32>
    %39 = vector.shape_cast %38 : vector<1x128x128xf32> to vector<128x128xf32>
    %40 = vector.shape_cast %37 : vector<128x128xf32> to vector<1x128x128xf32>
    tpu.vector_store %arg11[%c0_26, %c0_27, %c0_28], %40 {strides = array<i32>} : memref<1x128x128xf32, #tpu.memory_space<vmem>>, vector<1x128x128xf32>,
    return
  }
  func.func @transform_0(%arg0: i32) -> (i32, i32, i32) {
    %c0_i32 = arith.constant 0 : i32
    %c0_i32_0 = arith.constant 0 : i32
    %c0_i32_1 = arith.constant 0 : i32
    return %arg0, %c0_i32, %c0_i32_0 : i32, i32, i32
  }
  func.func @transform_1(%arg0: i32) -> (i32, i32) {
    %c0_i32 = arith.constant 0 : i32
    %c0_i32_0 = arith.constant 0 : i32
    %c0_i32_1 = arith.constant 0 : i32
    return %c0_i32, %c0_i32_0 : i32, i32
  }
  func.func @transform_2(%arg0: i32) -> (i32, i32) {
    %c0_i32 = arith.constant 0 : i32
    %c0_i32_0 = arith.constant 0 : i32
    %c0_i32_1 = arith.constant 0 : i32
    return %c0_i32, %c0_i32_0 : i32, i32
  }
  func.func @transform_3(%arg0: i32) -> (i32, i32) {
    %c0_i32 = arith.constant 0 : i32
    %c0_i32_0 = arith.constant 0 : i32
    %c0_i32_1 = arith.constant 0 : i32
    return %c0_i32, %c0_i32_0 : i32, i32
  }
  func.func @transform_4(%arg0: i32) -> (i32, i32) {
    %c0_i32 = arith.constant 0 : i32
    %c0_i32_0 = arith.constant 0 : i32
    %c0_i32_1 = arith.constant 0 : i32
    return %c0_i32, %c0_i32_0 : i32, i32
  }
  func.func @transform_5(%arg0: i32) -> (i32, i32) {
    %c0_i32 = arith.constant 0 : i32
    %c0_i32_0 = arith.constant 0 : i32
    %c0_i32_1 = arith.constant 0 : i32
    return %c0_i32, %c0_i32_0 : i32, i32
  }
  func.func @transform_6(%arg0: i32) -> (i32, i32) {
    %c0_i32 = arith.constant 0 : i32
    %c0_i32_0 = arith.constant 0 : i32
    %c0_i32_1 = arith.constant 0 : i32
    return %c0_i32, %c0_i32_0 : i32, i32
  }
  func.func @transform_7(%arg0: i32) -> (i32, i32) {
    %c0_i32 = arith.constant 0 : i32
    %c0_i32_0 = arith.constant 0 : i32
    %c0_i32_1 = arith.constant 0 : i32
    return %c0_i32, %c0_i32_0 : i32, i32
  }
  func.func @transform_8(%arg0: i32) -> (i32, i32) {
    %c0_i32 = arith.constant 0 : i32
    %c0_i32_0 = arith.constant 0 : i32
    %c0_i32_1 = arith.constant 0 : i32
    return %c0_i32, %c0_i32_0 : i32, i32
  }
  func.func @transform_9(%arg0: i32) -> (i32, i32) {
    %c0_i32 = arith.constant 0 : i32
    %c0_i32_0 = arith.constant 0 : i32
    %c0_i32_1 = arith.constant 0 : i32
    return %c0_i32, %c0_i32_0 : i32, i32
  }
  func.func @transform_10(%arg0: i32) -> (i32, i32, i32) {
    %c0_i32 = arith.constant 0 : i32
    %c0_i32_0 = arith.constant 0 : i32
    %c0_i32_1 = arith.constant 0 : i32
    return %arg0, %c0_i32, %c0_i32_0 : i32, i32, i32
  }
}

</mosaic_0001>

<bundles_post_ra>
// kernel: tpu_custom_call.1
= control target key start
LH: loop header
LB: loop body
LE: loop exit
PB: predicated region body
PF: predicated region fallthrough
CT: control target
= control target key end

     0   :  { %s4433_s0 = inlined_call_operand.hbm [shape: bf16[2,128,768], index: 0, kind: input, shape index: {}]   ;;  %s4434_s1 = inlined_call_operand.hbm [shape: bf16[768,128], index: 1, kind: input, shape index: {}]   ;;  %s4435_s2 = inlined_call_operand.vmem [shape: f32[1,128], index: 2, kind: input, shape index: {}]   ;;  %s4436_s3 = inlined_call_operand.hbm [shape: bf16[128,384], index: 3, kind: input, shape index: {}]   ;;  %s4437_s4 = inlined_call_operand.vmem [shape: f32[1,384], index: 4, kind: input, shape index: {}]   ;;  %s4438_s5 = inlined_call_operand.hbm [shape: bf16[128,128], index: 5, kind: input, shape index: {}]   ;;  %s4439_s6 = inlined_call_operand.vmem [shape: f32[1,128], index: 6, kind: input, shape index: {}]   ;;  %s4440_s7 = inlined_call_operand.vmem [shape: f32[1,128], index: 7, kind: input, shape index: {}]   ;;  %s4441_s8 = inlined_call_operand.hbm [shape: bf16[128,128], index: 8, kind: input, shape index: {}]   ;;  %s4442_s9 = inlined_call_operand.vmem [shape: f32[1,128], index: 9, kind: input, shape index: {}]   ;;  %s4443_s10 = inlined_call_operand.hbm [shape: f32[2,128,128], index: 10, kind: output, shape index: {}]  }
   0x1   :  { %4452 = sst [smem:[#allocation18_spill]] %s4442_s9 }
   0x2   :  { %4453 = sst [smem:[#allocation19_spill]] %s4443_s10 }
   0x3   :  { %15 = vsyncpa [#allocation3], 0 }
   0x4   :  { %17 = vsyncpa [#allocation3 + $0x1], 0 }
   0x5   :  { %18 = vsyncpa [#allocation6], 0 }
   0x6   :  { %19 = vsyncpa [#allocation9], 0 }
   0x7   :  { %20 = vsyncpa [#allocation4], 0 }
   0x8   :  { %22 = vsyncpa [#allocation4 + $0x1], 0  ;;  %s3771_s13 = smov 0   ;;  %s3773_s14 = smov 0  }
   0x9   :  { %s3775_s15 = smov 0   ;;  %s3777_s16 = smov 0  }
   0xa LB: > { %4454 = sst [smem:[#allocation16_spill]] %s3687_s13  ;;  %s3792_s17 = sadd.s32 4294967295, %s3699_s16   ;;  %s3699_s16 = sphi %s3777_s16, %s4481_s16   ;;  %s3695_s15 = sphi %s3775_s15, %s4480_s15   ;;  %s3691_s14 = sphi %s3773_s14, %s4479_s14   ;;  %s3687_s13 = sphi %s3771_s13, %s4478_s13  }
   0xb   : > { %s2608_s18 = sadd.s32 4294967294, %s3699_s16   ;;  %p48_p0 = scmp.ne.s32.totalorder %s3691_s14, %s3687_s13 }
   0xc   : > { %p4444_p1 = scmp.eq.s32.totalorder %s3792_s17, 0  ;;  %p267_p3 = scmp.eq.s32.totalorder %s2608_s18, 1 }
   0xd   : > { %p2609_p5 = scmp.ge.s32.totalorder %s3699_s16, 1  ;;  %p274_p7 = scmp.lt.s32.totalorder %s3699_s16, 3 }
   0xe   : > { %p3801_p4 = por %p4444_p1, %p48_p0  ;;  %p3806_p6 = por %p267_p3, %p48_p0 }
   0xf   : > { %p3811_p8 = pnand %p2609_p5, %p274_p7  ;;  %s3701_s22 = smov [#allocation5]  }
  0x10   : > { %s4455_s19 = scalar_select %p3801_p4, 1, 0 }
  0x11   : > { %s4456_s20 = scalar_select %p3806_p6, 1, 0 }
  0x12   : > { %s4458_s21 = scalar_select %p3811_p8, 1, 0 }
  0x13   : > { %4457 = sst [smem:[#allocation17_spill]] %s4456_s20  ;;  %s286_s23 = sshll.u32 %s3701_s22, 4  ;;  %s3815_s23 = int_to_ptr.vmem [resolvable:$true] %s286_s23 }
  0x14   : > { %p3239_p9 = pneg %p3811_p8  ;;  %s3702_s25 = smov [#allocation8]  }
  0x15   : > { %s318_s26 = sshll.u32 %s3702_s25, 4  ;;  %s3703_s27 = smov [#allocation7]   ;;  %s3826_s26 = int_to_ptr.vmem [resolvable:$true] %s318_s26 }
  0x16   : > { %p3822_p11 = pnand %p3239_p9, %p4444_p1  ;;  %s3828_s28 = sshll.u32 %s3703_s27, 4  ;;  %s303_s28 = int_to_ptr.vmem [resolvable:$true] %s3828_s28 }
  0x17   : > { %s3483_s11 = scalar_lea.hbm %s4434_s1, 6144 }
  0x18   : > { %p3484_p12 = scmp.ne.s32.totalorder %s4434_s1, %s3483_s11  ;;  %p3838_p13 = pneg %p3822_p11 }
  0x19   : > { %p3490_p5 = scmp.lt.u32.totalorder %s3483_s11, %s4434_s1 }
  0x1a   : > { %p3486_p0 = pnand %p3838_p13, %p3484_p12 }
  0x1c   : > { %p3487_p3 = pneg %p3486_p0 }
  0x1e   : > { %p3492_p7 = pnand %p3490_p5, %p3487_p3 }
  0x20   : > { %3495 = shalt.err (!%p3492_p7)
}
  0x21   : > { %s3496_s29 = scalar_lea.vmem %s3815_s23, 6144  ;;  %p3504_p2 = scmp.lt.s32.totalorder %s3815_s23, %s3815_s23 }
  0x22   : > { %p3497_p9 = scmp.ne.s32.totalorder %s3815_s23, %s3496_s29  ;;  %p3505_p6 = scmp.lt.s32.totalorder %s3496_s29, %s3496_s29 }
  0x24   : > { %p3499_p10 = pnand %p3497_p9, %p3838_p13  ;;  %p3506_p12 = por %p3505_p6, %p3504_p2 }
  0x26   : > { %p3500_p1 = pneg %p3499_p10 }
  0x28   : > { %p3507_p0 = pnand %p3506_p12, %p3500_p1 }
  0x2a   : > { %3510 = shalt.err (!%p3507_p0)
}
  0x2b   : > { %s4450_s30 = smov 64   ;;  %s4451_s11 = smov 4  }
  0x2c   : > { %3242 = dma.hbm_to_vmem [thread:$0]  (!%p3822_p11), %s4434_s1, 6144, %s3815_s23, [#allocation6], %s4450_s30, %s4450_s30, %s4451_s11  }
  0x2d   : > { %s3511_s29 = scalar_lea.hbm %s4438_s5, 1024 }
  0x2e   : > { %p3512_p1 = scmp.ne.s32.totalorder %s4438_s5, %s3511_s29  ;;  %p3518_p10 = scmp.lt.u32.totalorder %s3511_s29, %s4438_s5 }
  0x30   : > { %p3514_p2 = pnand %p3512_p1, %p3838_p13 }
  0x32   : > { %p3515_p6 = pneg %p3514_p2 }
  0x34   : > { %p3520_p3 = pnand %p3518_p10, %p3515_p6 }
  0x36   : > { %3523 = shalt.err (!%p3520_p3)
}
  0x37   : > { %s3524_s23 = scalar_lea.vmem %s3826_s26, 1024  ;;  %p3532_p12 = scmp.lt.s32.totalorder %s3826_s26, %s3826_s26 }
  0x38   : > { %p3525_p5 = scmp.ne.s32.totalorder %s3826_s26, %s3524_s23  ;;  %p3533_p0 = scmp.lt.s32.totalorder %s3524_s23, %s3524_s23 }
  0x3a   : > { %p3527_p7 = pnand %p3525_p5, %p3838_p13  ;;  %p3534_p1 = por %p3533_p0, %p3532_p12 }
  0x3c   : > { %p3528_p9 = pneg %p3527_p7 }
  0x3e   : > { %p3535_p2 = pnand %p3534_p1, %p3528_p9 }
  0x40   : > { %3538 = shalt.err (!%p3535_p2)
}
  0x41   : > { %3248 = dma.hbm_to_vmem [thread:$0]  (!%p3822_p11), %s4438_s5, 1024, %s3826_s26, [#allocation9], %s4450_s30, %s4450_s30, %s4451_s11  }
  0x42   : > { %s3539_s12 = scalar_lea.hbm %s4436_s3, 3072 }
  0x43   : > { %p3540_p6 = scmp.ne.s32.totalorder %s4436_s3, %s3539_s12  ;;  %p3546_p5 = scmp.lt.u32.totalorder %s3539_s12, %s4436_s3 }
  0x45   : > { %p3542_p10 = pnand %p3540_p6, %p3838_p13 }
  0x47   : > { %p3543_p3 = pneg %p3542_p10 }
  0x49   : > { %p3548_p7 = pnand %p3546_p5, %p3543_p3 }
  0x4b   : > { %3551 = shalt.err (!%p3548_p7)
}
  0x4c   : > { %s3552_s23 = scalar_lea.vmem %s303_s28, 3072  ;;  %p3560_p1 = scmp.lt.s32.totalorder %s303_s28, %s303_s28 }
  0x4d   : > { %p3553_p9 = scmp.ne.s32.totalorder %s303_s28, %s3552_s23  ;;  %p3561_p2 = scmp.lt.s32.totalorder %s3552_s23, %s3552_s23 }
  0x4f   : > { %p3555_p12 = pnand %p3553_p9, %p3838_p13  ;;  %p3562_p4 = por %p3561_p2, %p3560_p1 }
  0x51   : > { %p3556_p0 = pneg %p3555_p12 }
  0x53   : > { %p3563_p8 = pnand %p3562_p4, %p3556_p0 }
  0x55   : > { %3566 = shalt.err (!%p3563_p8)
}
  0x56   : > { %s3706_s26 = smov 192   ;;  %s3707_s9 = smov 12  }
  0x57   : > { %3245 = dma.hbm_to_vmem [thread:$0]  (!%p3822_p11), %s4436_s3, 3072, %s303_s28, [#allocation6], %s3706_s26, %s3706_s26, %s3707_s9  }
  0x58   : > { %s3708_s20 = smov [#allocation10]   ;;  %s3567_s27 = scalar_lea.hbm %s4441_s8, 1024 }
  0x59   : > { %s337_s12 = sshll.u32 %s3708_s20, 4  ;;  %p3568_p4 = scmp.ne.s32.totalorder %s4441_s8, %s3567_s27  ;;  %s338_s12 = int_to_ptr.vmem [resolvable:$true] %s337_s12 }
  0x5a   : > { %p3574_p10 = scmp.lt.u32.totalorder %s3567_s27, %s4441_s8 }
  0x5b   : > { %p3570_p8 = pnand %p3568_p4, %p3838_p13 }
  0x5d   : > { %p3571_p6 = pneg %p3570_p8 }
  0x5f   : > { %p3576_p3 = pnand %p3574_p10, %p3571_p6 }
  0x61   : > { %3579 = shalt.err (!%p3576_p3)
}
  0x62   : > { %s3580_s28 = scalar_lea.vmem %s338_s12, 1024  ;;  %p3588_p12 = scmp.lt.s32.totalorder %s338_s12, %s338_s12 }
  0x63   : > { %p3581_p5 = scmp.ne.s32.totalorder %s338_s12, %s3580_s28  ;;  %p3589_p0 = scmp.lt.s32.totalorder %s3580_s28, %s3580_s28 }
  0x65   : > { %p3583_p7 = pnand %p3581_p5, %p3838_p13  ;;  %p3590_p1 = por %p3589_p0, %p3588_p12 }
  0x67   : > { %p3584_p9 = pneg %p3583_p7 }
  0x69   : > { %p3591_p2 = pnand %p3590_p1, %p3584_p9 }
  0x6b   : > { %3594 = shalt.err (!%p3591_p2)
}
  0x6c   : > { %s4461_s26 = smov 4   ;;  %s4462_s9 = smov 64  }
  0x6d   : > { %3251 = dma.hbm_to_vmem [thread:$0]  (!%p3822_p11), %s4441_s8, 1024, %s338_s12, [#allocation9], %s4462_s9, %s4462_s9, %s4461_s26  }
  0x6e   : > { %s3929_s22 = sadd.s32 1, %s3699_s16   ;;  %s35_s24 = sadd.s32 1, %s3695_s15 }
  0x6f   : > { %s32_s10 = ssub.s32 %s3699_s16, %s3929_s22  ;;  %p42_p13 = scmp.ne.s32.totalorder %s3695_s15, %s3691_s14 }
  0x70   : > { %p33_p4 = scmp.eq.s32.totalorder %s32_s10, 0  ;;  %p43_p8 = scmp.eq.s32.totalorder %s3699_s16, 0 }
  0x71   : > { %p4463_p6 = scmp.eq.s32.totalorder %s3792_s17, 1  ;;  %p3264_p3 = scmp.lt.s32.totalorder %s3699_s16, 2 }
  0x72   : > { %s3945_s20 = scalar_select %p33_p4, %s3695_s15, %s35_s24  }
  0x73   : > { %p3939_p10 = por %p4463_p6, %p42_p13  ;;  %p44_p5 = por %p43_p8, %p42_p13 }
  0x74   : > { %s354_s18 = sand.u32 1, %s3695_s15   ;;  %s3217_s12 = smul.u32 6144, %s3699_s16 }
  0x75   : > { %s3216_s25 = smul.u32 384, %s354_s18  ;;  %p3949_p11 = pnand %p3264_p3, %p44_p5 }
  0x76   : > { %s3956_s28 = scalar_lea.hbm %s4433_s0, %s3217_s12  ;;  %s3960_s30 = scalar_lea.sflag [#allocation3], %s354_s18 }
  0x77   : > { %s358_s26 = scalar_lea.vmem [#allocation2], %s3216_s25  ;;  %s3595_s11 = scalar_lea.hbm %s3956_s28, 6144 }
  0x78   : > { %s365_s9 = sshll.u32 %s358_s26, 4  ;;  %p3596_p7 = scmp.ne.s32.totalorder %s3956_s28, %s3595_s11  ;;  %s3958_s9 = int_to_ptr.vmem [resolvable:$true] %s365_s9 }
  0x79   : > { %p3597_p9 = pneg %p3949_p11  ;;  %s3600_s12 = scalar_lea.hbm %s4433_s0, 12288 }
  0x7a   : > { %p3601_p1 = scmp.lt.u32.totalorder %s3956_s28, %s4433_s0  ;;  %p3602_p2 = scmp.lt.u32.totalorder %s3600_s12, %s3595_s11 }
  0x7b   : > { %p3598_p12 = pnand %p3597_p9, %p3596_p7  ;;  %p3604_p4 = scmp.lt.u32.totalorder %s3595_s11, %s3956_s28 }
  0x7c   : > { %p3603_p13 = por %p3602_p2, %p3601_p1 }
  0x7d   : > { %p3599_p0 = pneg %p3598_p12 }
  0x7e   : > { %p3605_p8 = por %p3604_p4, %p3603_p13 }
  0x80   : > { %p3606_p6 = pnand %p3605_p8, %p3599_p0 }
  0x82   : > { %3609 = shalt.err (!%p3606_p6)
}
  0x83   : > { %s3610_s18 = scalar_lea.vmem %s3958_s9, 6144  ;;  %s3709_s25 = smov [#allocation2]  }
  0x84   : > { %p3611_p3 = scmp.ne.s32.totalorder %s3958_s9, %s3610_s18  ;;  %s3615_s26 = sshll.u32 %s3709_s25, 4  ;;  %s3616_s26 = int_to_ptr.vmem [resolvable:$false] %s3615_s26 }
  0x85   : > { %s3617_s24 = scalar_lea.vmem %s3616_s26, 12288  ;;  %p3618_p12 = scmp.lt.s32.totalorder %s3958_s9, %s3616_s26 }
  0x86   : > { %p3613_p5 = pnand %p3611_p3, %p3597_p9  ;;  %p3619_p1 = scmp.lt.s32.totalorder %s3617_s24, %s3610_s18 }
  0x88   : > { %p3614_p7 = pneg %p3613_p5  ;;  %p3620_p2 = por %p3619_p1, %p3618_p12 }
  0x8a   : > { %p3621_p13 = pnand %p3620_p2, %p3614_p7 }
  0x8c   : > { %3624 = shalt.err (!%p3621_p13)
}
  0x8d   : > { %s3710_s11 = smov 384   ;;  %s3711_s10 = smov 24  }
  0x8e   : > { %3255 = dma.hbm_to_vmem [thread:$0]  (!%p3949_p11), %s3956_s28, 6144, %s3958_s9, %s3960_s30, %s3710_s11, %s3710_s11, %s3711_s10  }
  0x8f   : > { %p4466_p9 = scmp.ne.s32.totalorder %s4458_s21, 0 }
  0x90   : > { %s3991_s12 = sand.u32 (!%p4466_p9), 1, %s3691_s14   ;;  %p4467_p0 = scmp.ne.s32.totalorder (!%p4466_p9), %s4455_s19, 0 }
  0x91   : > { %377 = sbr.rel (%p4466_p9) target bundleno = 1781 (0x6f5), region = 60  ;;  %s380_s23 = scalar_lea.sflag (!%p4466_p9), [#allocation3], %s3991_s12 }
  0x92   : > { %s3218_s29 = smul.u32 (!%p4466_p9), 384, %s3991_s12 }
  0x94   : > { %s3995_s18 = scalar_lea.vmem (!%p4466_p9), [#allocation2], %s3218_s29 }
  0x98   : > { %3670 = dma.done.wait (%p4467_p0), %s380_s23, 6144  }
  0x99   : > { %3672 = vsyncadd (%p4467_p0), %s380_s23, 4294961152  ;;  %p4468_p11 = scmp.eq.s32.totalorder %s3792_s17, 0 }
  0x9b   : > { %3674 = dma.done.wait (%p4468_p11), [#allocation6], 9216   ;;  %p4469_p4 = pmov %p4468_p11 }
  0x9d   : > { %3676 = vsyncadd (%p4469_p4), [#allocation6], 4294958080  ;;  %p4470_p8 = pmov %p4469_p4 }
  0x9e   : > { %p4471_p6 = pmov %p4469_p4 }
  0x9f   : > { %3678 = dma.done.wait (%p4470_p8), [#allocation9], 2048  }
  0xa0   : > { %3680 = vsyncadd (%p4471_p6), [#allocation9], 4294965248  ;;  %v3315_v0 = vld [vmem:[#allocation5 + $0x40] sm:$0xff]   ;;  %v3319_v4 = vld [vmem:[#allocation5 + $0x48] sm:$0xff]   ;;  %s2621_s24 = sshll.u32 %s3991_s12, 7  ;;  %s4472_s29 = sld [smem:[#allocation18_spill]] }
  0xa1   : > { %v3316_v1 = vld [vmem:[#allocation5] sm:$0xff]   ;;  %2768 = vmatprep.subr.bf16.mxu0 %v3315_v0  ;;  %v3320_v5 = vld [vmem:[#allocation5 + $0x8] sm:$0xff]   ;;  %v3323_v8 = vld [vmem:[#allocation5 + $0x50] sm:$0xff]   ;;  %s4364_s23 = scalar_lea.vmem [#allocation11], %s2621_s24  ;;  %s4473_s28 = sld [smem:[#allocation19_spill]] }
  0xa2   : > { %v3317_v2 = vld [vmem:[#allocation5 + $0xc0] sm:$0xff]   ;;  %2769 = vmatpush3.bf16.msra.mxu0 %v3316_v1  ;;  %v3321_v6 = vld [vmem:[#allocation5 + $0xc8] sm:$0xff]   ;;  %v3324_v9 = vld [vmem:[#allocation5 + $0x10] sm:$0xff]   ;;  %s2497_s19 = sshll.u32 %s4364_s23, 4  ;;  %s3713_s25 = smov [#allocation11]   ;;  %s4386_s19 = int_to_ptr.vmem [resolvable:$true] %s2497_s19 }
  0xa3   : > { %v3318_v3 = vld [vmem:[#allocation5 + $0x80] sm:$0xff]   ;;  %2832 = vmatprep.subr.bf16.mxu1 %v3317_v2  ;;  %2770 = vmatprep.subr.bf16.mxu0 %v3319_v4  ;;  %v3322_v7 = vld [vmem:[#allocation5 + $0x88] sm:$0xff]   ;;  %v3325_v10 = vld [vmem:[#allocation5 + $0xd0] sm:$0xff]   ;;  %s3625_s30 = scalar_lea.vmem %s4386_s19, 2048  ;;  %s3629_s26 = sshll.u32 %s3713_s25, 4  ;;  %s3630_s26 = int_to_ptr.vmem [resolvable:$false] %s3629_s26 }
  0xa4   : > { %2833 = vmatpush3.bf16.msra.mxu1 %v3318_v3  ;;  %v3326_v11 = vld [vmem:[#allocation5 + $0x90] sm:$0xff]   ;;  %v3327_v12 = vld [vmem:[#allocation5 + $0x58] sm:$0xff]   ;;  %v3331_v16 = vld [vmem:[#allocation5 + $0x60] sm:$0xff]   ;;  %p3626_p3 = scmp.ne.s32.totalorder %s4386_s19, %s3625_s30  ;;  %s3631_s24 = scalar_lea.vmem %s3630_s26, 4096 }
  0xa5   : > { %2834 = vmatprep.subr.bf16.mxu1 %v3321_v6  ;;  %v3328_v13 = vld [vmem:[#allocation5 + $0x18] sm:$0xff]   ;;  %v3332_v17 = vld [vmem:[#allocation5 + $0x20] sm:$0xff]   ;;  %v3335_v20 = vld [vmem:[#allocation5 + $0x68] sm:$0xff]   ;;  %p3632_p12 = scmp.lt.s32.totalorder %s4386_s19, %s3630_s26  ;;  %p3633_p1 = scmp.lt.s32.totalorder %s3631_s24, %s3625_s30 }
  0xa6   : > { %2771 = vmatpush3.bf16.msra.mxu0 %v3320_v5  ;;  %v3329_v14 = vld [vmem:[#allocation5 + $0xd8] sm:$0xff]   ;;  %v3333_v18 = vld [vmem:[#allocation5 + $0xe0] sm:$0xff]   ;;  %v3336_v21 = vld [vmem:[#allocation5 + $0x28] sm:$0xff]   ;;  %p3627_p5 = pnand %p3626_p3, %p3939_p10 }
  0xa7   : > { %2772 = vmatprep.subr.bf16.mxu0 %v3323_v8  ;;  %v3330_v15 = vld [vmem:[#allocation5 + $0x98] sm:$0xff]   ;;  %v3334_v19 = vld [vmem:[#allocation5 + $0xa0] sm:$0xff]   ;;  %v3337_v22 = vld [vmem:[#allocation5 + $0xe8] sm:$0xff]   ;;  %p3634_p2 = por %p3633_p1, %p3632_p12 }
  0xa8   : > { %2835 = vmatpush3.bf16.msra.mxu1 %v3322_v7  ;;  %v3338_v23 = vld [vmem:[#allocation5 + $0xa8] sm:$0xff]   ;;  %v3339_v24 = vld [vmem:[#allocation5 + $0x70] sm:$0xff]   ;;  %v3343_v28 = vld [vmem:[#allocation5 + $0x78] sm:$0xff]   ;;  %p3628_p7 = pneg %p3627_p5 }
  0xa9   : > { %2836 = vmatprep.subr.bf16.mxu1 %v3325_v10  ;;  %v3340_v25 = vld [vmem:[#allocation5 + $0x30] sm:$0xff]   ;;  %v3344_v29 = vld [vmem:[#allocation5 + $0x38] sm:$0xff]   ;;  %v3350_v34 = vld [vmem:[#allocation5 + $0x140] sm:$0xff]  }
  0xaa   : > { %2773 = vmatpush3.bf16.msra.mxu0 %v3324_v9  ;;  %v3341_v26 = vld [vmem:[#allocation5 + $0xf0] sm:$0xff]   ;;  %v3345_v30 = vld [vmem:[#allocation5 + $0xf8] sm:$0xff]   ;;  %v3351_v35 = vld [vmem:[%s3995_s18 + $0x8] ss:$24 sps:$4 sm:$0xff]   ;;  %p3635_p13 = pnand %p3634_p2, %p3628_p7 }
  0xab   : > { %2774 = vmatprep.subr.bf16.mxu0 %v3327_v12  ;;  %v3342_v27 = vld [vmem:[#allocation5 + $0xb0] sm:$0xff]   ;;  %v3346_v31 = vld [vmem:[%s3995_s18] ss:$24 sps:$4 sm:$0xff]   ;;  %v3348_v32 = vld [vmem:[%s3995_s18 + $0x4] ss:$24 sps:$4 sm:$0xff]  }
  0xac   : > { %2837 = vmatpush3.bf16.msra.mxu1 %v3326_v11  ;;  %v3349_v33 = vld [vmem:[#allocation5 + $0xb8] sm:$0xff]   ;;  %1148 = vmatprep.mubr.bf16.mxu0 %v3348_v32  ;;  %v3353_v36 = vld [vmem:[%s3995_s18 + $0xc] ss:$24 sps:$4 sm:$0xff]   ;;  %v3357_v39 = vld [vmem:[%s3995_s18 + $0x30] ss:$24 sps:$4 sm:$0xff]  }
  0xad   : > { %2838 = vmatprep.subr.bf16.mxu1 %v3329_v14  ;;  %v3354_v37 = vld [vmem:[#allocation5 + $0x100] sm:$0xff]   ;;  %1245 = vmatprep.mubr.bf16.mxu1 %v3353_v36  ;;  %v3355_v38 = vld [vmem:[%s3995_s18 + $0x34] ss:$24 sps:$4 sm:$0xff]   ;;  %v3362_v43 = vld [vmem:[%s3995_s18 + $0x38] ss:$24 sps:$4 sm:$0xff]  }
  0xae   : > { %2775 = vmatpush3.bf16.msra.mxu0 %v3328_v13  ;;  %v3358_v40 = vld [vmem:[#allocation5 + $0x148] sm:$0xff]   ;;  %v3359_v41 = vld [vmem:[%s3995_s18 + $0x3c] ss:$24 sps:$4 sm:$0xff]   ;;  %v3365_v48 = vld [vmem:[%s3995_s18 + $0x60] ss:$24 sps:$4 sm:$0xff]  }
  0xaf   : > { %2776 = vmatprep.subr.bf16.mxu0 %v3331_v16  ;;  %v3361_v42 = vld [vmem:[#allocation5 + $0x108] sm:$0xff]   ;;  %v3363_v44 = vld [vmem:[%s3995_s18 + $0x64] ss:$24 sps:$4 sm:$0xff]   ;;  %v3366_v45 = vld [vmem:[#allocation5 + $0x150] sm:$0xff]  }
  0xb0   : > { %2839 = vmatpush3.bf16.msra.mxu1 %v3330_v15  ;;  %v3367_v46 = vld [vmem:[%s3995_s18 + $0x6c] ss:$24 sps:$4 sm:$0xff]   ;;  %v3369_v47 = vld [vmem:[#allocation5 + $0x110] sm:$0xff]   ;;  %v3374_v50 = vld [vmem:[#allocation5 + $0x158] sm:$0xff]  }
  0xb1   : > { %2840 = vmatprep.subr.bf16.mxu1 %v3333_v18  ;;  %v3371_v49 = vld [vmem:[%s3995_s18 + $0x94] ss:$24 sps:$4 sm:$0xff]   ;;  %v3370_v51 = vld [vmem:[%s3995_s18 + $0x68] ss:$24 sps:$4 sm:$0xff]   ;;  %v3377_v52 = vld [vmem:[#allocation5 + $0x118] sm:$0xff]  }
  0xb2   : > { %2777 = vmatpush3.bf16.msra.mxu0 %v3332_v17  ;;  %v3375_v53 = vld [vmem:[%s3995_s18 + $0x9c] ss:$24 sps:$4 sm:$0xff]   ;;  %v3382_v54 = vld [vmem:[#allocation5 + $0x160] sm:$0xff]   ;;  %v3373_v56 = vld [vmem:[%s3995_s18 + $0x90] ss:$24 sps:$4 sm:$0xff]  }
  0xb3   : > { %2778 = vmatprep.subr.bf16.mxu0 %v3335_v20  ;;  %v3385_v55 = vld [vmem:[#allocation5 + $0x120] sm:$0xff]   ;;  %v3390_v58 = vld [vmem:[#allocation5 + $0x168] sm:$0xff]   ;;  %v3378_v59 = vld [vmem:[%s3995_s18 + $0x98] ss:$24 sps:$4 sm:$0xff]  }
  0xb4   : > { %2841 = vmatpush3.bf16.msra.mxu1 %v3334_v19  ;;  %v3379_v57 = vld [vmem:[%s3995_s18 + $0xc4] ss:$24 sps:$4 sm:$0xff]   ;;  %v3393_v61 = vld [vmem:[#allocation5 + $0x128] sm:$0xff]   ;;  %v3398_v62 = vld [vmem:[#allocation5 + $0x170] sm:$0xff]  }
  0xb5   : > { %2842 = vmatprep.subr.bf16.mxu1 %v3337_v22  ;;  %v3383_v60 = vld [vmem:[%s3995_s18 + $0xcc] ss:$24 sps:$4 sm:$0xff]   ;;  %v3381_v63 = vld [vmem:[%s3995_s18 + $0xc0] ss:$24 sps:$4 sm:$0xff]   ;;  %v3401_v1 = vld [vmem:[#allocation5 + $0x130] sm:$0xff]  }
  0xb6   : > { %2779 = vmatpush3.bf16.msra.mxu0 %v3336_v21  ;;  %v3387_v0 = vld [vmem:[%s3995_s18 + $0xf4] ss:$24 sps:$4 sm:$0xff]   ;;  %v3386_v2 = vld [vmem:[%s3995_s18 + $0xc8] ss:$24 sps:$4 sm:$0xff]   ;;  %v3406_v3 = vld [vmem:[#allocation5 + $0x178] sm:$0xff]  }
  0xb7   : > { %2780 = vmatprep.subr.bf16.mxu0 %v3339_v24  ;;  %v3391_v4 = vld [vmem:[%s3995_s18 + $0xfc] ss:$24 sps:$4 sm:$0xff]   ;;  %v3389_v6 = vld [vmem:[%s3995_s18 + $0xf0] ss:$24 sps:$4 sm:$0xff]   ;;  %v3399_v9 = vld [vmem:[%s3995_s18 + $0x12c] ss:$24 sps:$4 sm:$0xff]  }
  0xb8   : > { %2843 = vmatpush3.bf16.msra.mxu1 %v3338_v23  ;;  %v3409_v5 = vld [vmem:[#allocation5 + $0x138] sm:$0xff]   ;;  %v3403_v11 = vld [vmem:[%s3995_s18 + $0x154] ss:$24 sps:$4 sm:$0xff]   ;;  %v3402_v12 = vld [vmem:[%s3995_s18 + $0x128] ss:$24 sps:$4 sm:$0xff]  }
  0xb9   : > { %2844 = vmatprep.subr.bf16.mxu1 %v3341_v26  ;;  %v3395_v7 = vld [vmem:[%s3995_s18 + $0x124] ss:$24 sps:$4 sm:$0xff]   ;;  %v3394_v8 = vld [vmem:[%s3995_s18 + $0xf8] ss:$24 sps:$4 sm:$0xff]   ;;  %v3413_v15 = vld [vmem:[%s3995_s18 + $0x14] ss:$24 sps:$4 sm:$0xff]  }
  0xba   : > { %2781 = vmatpush3.bf16.msra.mxu0 %v3340_v25  ;;  %v3397_v10 = vld [vmem:[%s3995_s18 + $0x120] ss:$24 sps:$4 sm:$0xff]   ;;  %v3407_v13 = vld [vmem:[%s3995_s18 + $0x15c] ss:$24 sps:$4 sm:$0xff]   ;;  %v3405_v14 = vld [vmem:[%s3995_s18 + $0x150] ss:$24 sps:$4 sm:$0xff]  }
  0xbb   : > { %2782 = vmatprep.subr.bf16.mxu0 %v3343_v28  ;;  %v3410_v16 = vld [vmem:[%s3995_s18 + $0x158] ss:$24 sps:$4 sm:$0xff]   ;;  %v3414_v18 = vld [vmem:[%s3995_s18 + $0x44] ss:$24 sps:$4 sm:$0xff]   ;;  %v3417_v20 = vld [vmem:[%s3995_s18 + $0x74] ss:$24 sps:$4 sm:$0xff]  }
  0xbc   : > { %2845 = vmatpush3.bf16.msra.mxu1 %v3342_v27  ;;  %v3411_v17 = vld [vmem:[%s3995_s18 + $0x10] ss:$24 sps:$4 sm:$0xff]   ;;  %v3416_v19 = vld [vmem:[%s3995_s18 + $0x40] ss:$24 sps:$4 sm:$0xff]   ;;  %v3420_v22 = vld [vmem:[%s3995_s18 + $0xa4] ss:$24 sps:$4 sm:$0xff]  }
  0xbd   : > { %2846 = vmatprep.subr.bf16.mxu1 %v3345_v30  ;;  %v3419_v21 = vld [vmem:[%s3995_s18 + $0x70] ss:$24 sps:$4 sm:$0xff]   ;;  %v3422_v23 = vld [vmem:[%s3995_s18 + $0xa0] ss:$24 sps:$4 sm:$0xff]   ;;  %v3423_v24 = vld [vmem:[%s3995_s18 + $0xd4] ss:$24 sps:$4 sm:$0xff]  }
  0xbe   : > { %2783 = vmatpush3.bf16.msra.mxu0 %v3344_v29  ;;  %v3425_v25 = vld [vmem:[%s3995_s18 + $0xd0] ss:$24 sps:$4 sm:$0xff]   ;;  %v3426_v26 = vld [vmem:[%s3995_s18 + $0x104] ss:$24 sps:$4 sm:$0xff]   ;;  %v3435_v27 = vld [vmem:[#allocation7] ss:$12 sps:$4 sm:$0xff]  }
  0xbf   : > { %2896 = vmatprep.subr.bf16.mxu0 %v3350_v34  ;;  %v3437_v28 = vld [vmem:[#allocation7 + $0x4] ss:$12 sps:$4 sm:$0xff]   ;;  %v3428_v29 = vld [vmem:[%s3995_s18 + $0x100] ss:$24 sps:$4 sm:$0xff]   ;;  %v3429_v30 = vld [vmem:[%s3995_s18 + $0x134] ss:$24 sps:$4 sm:$0xff]  }
  0xc0   : > { %2847 = vmatpush3.bf16.msra.mxu1 %v3349_v33  ;;  %v3440_v32 = vld [vmem:[#allocation7 + $0x1c] ss:$12 sps:$4 sm:$0xff]   ;;  %v3443_v36 = vld [vmem:[#allocation7 + $0x34] ss:$12 sps:$4 sm:$0xff]  }
  0xc1   : > { %1149 = vmatmul.mubr.bf16.vlgmr.msra.gmra.mrb[0].mxu0 %v3346_v31  ;;  %1592 = vmatprep.subr.bf16.mxu1 %v3437_v28  ;;  %v3438_v31 = vld [vmem:[#allocation7 + $0x18] ss:$12 sps:$4 sm:$0xff]   ;;  %v3431_v33 = vld [vmem:[%s3995_s18 + $0x130] ss:$24 sps:$4 sm:$0xff]  }
  0xc2   : > { %2897 = vmatpush3.bf16.msra.mxu0 %v3354_v37  ;;  %1156 = vmatprep.mubr.bf16.mxu0 %v3355_v38  ;;  %v3432_v34 = vld [vmem:[%s3995_s18 + $0x164] ss:$24 sps:$4 sm:$0xff]   ;;  %v3434_v37 = vld [vmem:[%s3995_s18 + $0x160] ss:$24 sps:$4 sm:$0xff]   ;;  %v3444_v38 = vld [vmem:[#allocation7 + $0x48] ss:$12 sps:$4 sm:$0xff]  }
  0xc3   : > { %1246 = vmatmul.mubr.bf16.vlgmr.msra.gmra.mrb[0].mxu1 %v3351_v35  ;;  %2898 = vmatprep.subr.bf16.mxu0 %v3358_v40  ;;  %v3441_v35 = vld [vmem:[#allocation7 + $0x30] ss:$12 sps:$4 sm:$0xff]   ;;  %v3447_v40 = vld [vmem:[#allocation7 + $0x60] ss:$12 sps:$4 sm:$0xff]   ;;  %s2767_s18 = sshll.u32 %s3792_s17, 11  ;;  %s2484_s17 = scalar_lea.sflag [#allocation4], %s3991_s12 }
  0xc4   : > { %1253 = vmatprep.mubr.bf16.mxu1 %v3359_v41  ;;  %1593 = vmatpush1.bf16.msra.mxu1 %v3435_v27  ;;  %v3449_v41 = vld [vmem:[#allocation7 + $0x64] ss:$12 sps:$4 sm:$0xff]   ;;  %s4384_s9 = scalar_lea.hbm %s4473_s28, %s2767_s18 }
  0xc5   : > { %1594 = vmatprep.subr.bf16.mxu1 %v3440_v32 }
  0xc6   : > { %2899 = vmatpush3.bf16.msra.mxu0 %v3361_v42  ;;  %v3453_v42 = vld [vmem:[#allocation7 + $0x8] ss:$12 sps:$4 sm:$0xff]  }
  0xc7   : > { %2900 = vmatprep.subr.bf16.mxu0 %v3366_v45  ;;  %v3454_v45 = vld [vmem:[#allocation7 + $0x20] ss:$12 sps:$4 sm:$0xff]  }
  0xc8   : > { %1595 = vmatpush1.bf16.msra.mxu1 %v3438_v31 }
  0xc9   : > { %1157 = vmatmul.mubr.bf16.gmra.mrb[4].mxu0 %v3357_v39  ;;  %1596 = vmatprep.subr.bf16.mxu1 %v3443_v36  ;;  %v3446_v39 = vld [vmem:[#allocation7 + $0x4c] ss:$12 sps:$4 sm:$0xff]  }
  0xca   : > { %1164 = vmatprep.mubr.bf16.mxu0 %v3363_v44  ;;  %2901 = vmatpush3.bf16.msra.mxu0 %v3369_v47  ;;  %v3452_v44 = vld [vmem:[#allocation7 + $0x7c] ss:$12 sps:$4 sm:$0xff]  }
  0xcb   : > { %1254 = vmatmul.mubr.bf16.gmra.mrb[4].mxu1 %v3362_v43  ;;  %2902 = vmatprep.subr.bf16.mxu0 %v3374_v50  ;;  %v3450_v43 = vld [vmem:[#allocation7 + $0x78] ss:$12 sps:$4 sm:$0xff]   ;;  %v3455_v47 = vld [vmem:[#allocation7 + $0x90] ss:$12 sps:$4 sm:$0xff]   ;;  %v3463_v50 = vld [vmem:[#allocation7 + $0x68] ss:$12 sps:$4 sm:$0xff]  }
  0xcc   : > { %1261 = vmatprep.mubr.bf16.mxu1 %v3367_v46  ;;  %1597 = vmatpush1.bf16.msra.mxu1 %v3441_v35  ;;  %v3458_v46 = vld [vmem:[#allocation7 + $0x38] ss:$12 sps:$4 sm:$0xff]  }
  0xcd   : > { %1598 = vmatprep.subr.bf16.mxu1 %v3446_v39 }
  0xce   : > { %2903 = vmatpush3.bf16.msra.mxu0 %v3377_v52  ;;  %v3462_v52 = vld [vmem:[#allocation7 + $0xac] ss:$12 sps:$4 sm:$0xff]  }
  0xcf   : > { %2904 = vmatprep.subr.bf16.mxu0 %v3382_v54  ;;  %v3465_v54 = vld [vmem:[#allocation7 + $0x98] ss:$12 sps:$4 sm:$0xff]  }
  0xd0   : > { %1599 = vmatpush1.bf16.msra.mxu1 %v3444_v38 }
  0xd1   : > { %1165 = vmatmul.mubr.bf16.gmra.mrb[8].mxu0 %v3365_v48  ;;  %1600 = vmatprep.subr.bf16.mxu1 %v3449_v41  ;;  %v3457_v48 = vld [vmem:[#allocation7 + $0x94] ss:$12 sps:$4 sm:$0xff]  }
  0xd2   : > { %1172 = vmatprep.mubr.bf16.mxu0 %v3371_v49  ;;  %2905 = vmatpush3.bf16.msra.mxu0 %v3385_v55  ;;  %v3459_v49 = vld [vmem:[#allocation7 + $0x50] ss:$12 sps:$4 sm:$0xff]   ;;  %v3712_v55 = vmov 0  }
  0xd3   : > { %1262 = vmatmul.mubr.bf16.gmra.mrb[8].mxu1 %v3370_v51  ;;  %2906 = vmatprep.subr.bf16.mxu0 %v3390_v58  ;;  %v3460_v51 = vld [vmem:[#allocation7 + $0xa8] ss:$12 sps:$4 sm:$0xff]   ;;  %v4061_v58 = vld [vmem:[%s4435_s2] ss:$0 sm:$0xff] }
  0xd4   : > { %1269 = vmatprep.mubr.bf16.mxu1 %v3375_v53  ;;  %1601 = vmatpush1.bf16.msra.mxu1 %v3447_v40  ;;  %v3464_v53 = vld [vmem:[#allocation7 + $0x80] ss:$12 sps:$4 sm:$0xff]  }
  0xd5   : > { %1602 = vmatprep.subr.bf16.mxu1 %v3452_v44 }
  0xd6   : > { %2907 = vmatpush3.bf16.msra.mxu0 %v3393_v61 }
  0xd7   : > { %2908 = vmatprep.subr.bf16.mxu0 %v3398_v62 }
  0xd8   : > { %1603 = vmatpush1.bf16.msra.mxu1 %v3450_v43 }
  0xd9   : > { %1173 = vmatmul.mubr.bf16.gmra.mrb[12].mxu0 %v3373_v56  ;;  %1604 = vmatprep.subr.bf16.mxu1 %v3457_v48  ;;  %v3466_v56 = vld [vmem:[#allocation7 + $0xb0] ss:$12 sps:$4 sm:$0xff]  }
  0xda   : > { %1180 = vmatprep.mubr.bf16.mxu0 %v3379_v57  ;;  %2909 = vmatpush3.bf16.msra.mxu0 %v3401_v1 }
  0xdb   : > { %1270 = vmatmul.mubr.bf16.gmra.mrb[12].mxu1 %v3378_v59  ;;  %2910 = vmatprep.subr.bf16.mxu0 %v3406_v3 }
  0xdc   : > { %1277 = vmatprep.mubr.bf16.mxu1 %v3383_v60  ;;  %1605 = vmatpush1.bf16.msra.mxu1 %v3455_v47 }
  0xdd   : > { %1606 = vmatprep.subr.bf16.mxu1 %v3462_v52 }
  0xde   : > { %2911 = vmatpush3.bf16.msra.mxu0 %v3409_v5 }
  0xdf   : > { %3040 = vmatprep.subr.bf16.mxu0 %v3453_v42 }
  0xe0   : > { %1607 = vmatpush1.bf16.msra.mxu1 %v3460_v51 }
  0xe1   : > { %1181 = vmatmul.mubr.bf16.gmra.mrb[16].mxu0 %v3381_v63 }
  0xe2   : > { %1188 = vmatprep.mubr.bf16.mxu0 %v3387_v0 }
  0xe3   : > { %1278 = vmatmul.mubr.bf16.gmra.mrb[16].mxu1 %v3386_v2 }
  0xe4   : > { %1285 = vmatprep.mubr.bf16.mxu1 %v3391_v4 }
  0xe9   : > { %1189 = vmatmul.mubr.bf16.gmra.mrb[20].mxu0 %v3389_v6 }
  0xea   : > { %1196 = vmatprep.mubr.bf16.mxu0 %v3395_v7 }
  0xeb   : > { %1286 = vmatmul.mubr.bf16.gmra.mrb[20].mxu1 %v3394_v8 }
  0xec   : > { %1293 = vmatprep.mubr.bf16.mxu1 %v3399_v9 }
  0xf1   : > { %1197 = vmatmul.mubr.bf16.gmra.mrb[24].mxu0 %v3397_v10 }
  0xf2   : > { %1204 = vmatprep.mubr.bf16.mxu0 %v3403_v11 }
  0xf3   : > { %1294 = vmatmul.mubr.bf16.gmra.mrb[24].mxu1 %v3402_v12 }
  0xf4   : > { %1301 = vmatprep.mubr.bf16.mxu1 %v3407_v13 }
  0xf9   : > { %1205 = vmatmul.mubr.bf16.gmra.mrb[28].mxu0 %v3405_v14 }
  0xfa   : > { %1342 = vmatprep.mubr.bf16.mxu0 %v3413_v15 }
  0xfb   : > { %1302 = vmatmul.mubr.bf16.gmra.mrb[28].mxu1 %v3410_v16 }
  0xfc   : > { %1624 = vmatprep.mubr.bf16.mxu1 %v3712_v55 }
 0x101   : > { %1343 = vmatmul.mubr.bf16.vlgmr.msra.gmra.mrb[32].mxu0 %v3411_v17 }
 0x102   : > { %1350 = vmatprep.mubr.bf16.mxu0 %v3414_v18  ;;  %3041 = vmatpush3.bf16.msra.mxu0 %v3453_v42 }
 0x103   : > { %3042 = vmatprep.subr.bf16.mxu0 %v3454_v45 }
 0x106   : > { %3043 = vmatpush3.bf16.msra.mxu0 %v3454_v45 }
 0x107   : > { %3044 = vmatprep.subr.bf16.mxu0 %v3458_v46 }
 0x109   : > { %1351 = vmatmul.mubr.bf16.gmra.mrb[36].mxu0 %v3416_v19 }
 0x10a   : > { %1358 = vmatprep.mubr.bf16.mxu0 %v3417_v20  ;;  %3045 = vmatpush3.bf16.msra.mxu0 %v3458_v46 }
 0x10b   : > { %3046 = vmatprep.subr.bf16.mxu0 %v3459_v49 }
 0x10e   : > { %3047 = vmatpush3.bf16.msra.mxu0 %v3459_v49 }
 0x10f   : > { %3048 = vmatprep.subr.bf16.mxu0 %v3463_v50 }
 0x111   : > { %1359 = vmatmul.mubr.bf16.gmra.mrb[40].mxu0 %v3419_v21 }
 0x112   : > { %1366 = vmatprep.mubr.bf16.mxu0 %v3420_v22  ;;  %3049 = vmatpush3.bf16.msra.mxu0 %v3463_v50 }
 0x113   : > { %3050 = vmatprep.subr.bf16.mxu0 %v3464_v53 }
 0x116   : > { %3051 = vmatpush3.bf16.msra.mxu0 %v3464_v53 }
 0x117   : > { %3052 = vmatprep.subr.bf16.mxu0 %v3465_v54 }
 0x119   : > { %1367 = vmatmul.mubr.bf16.gmra.mrb[44].mxu0 %v3422_v23 }
 0x11a   : > { %1374 = vmatprep.mubr.bf16.mxu0 %v3423_v24  ;;  %3053 = vmatpush3.bf16.msra.mxu0 %v3465_v54 }
 0x11b   : > { %3054 = vmatprep.subr.bf16.mxu0 %v3466_v56 }
 0x11e   : > { %3055 = vmatpush3.bf16.msra.mxu0 %v3466_v56 }
 0x121   : > { %1375 = vmatmul.mubr.bf16.gmra.mrb[48].mxu0 %v3425_v25 }
 0x122   : > { %1382 = vmatprep.mubr.bf16.mxu0 %v3426_v26 }
 0x129   : > { %1383 = vmatmul.mubr.bf16.gmra.mrb[52].mxu0 %v3428_v29 }
 0x12a   : > { %1390 = vmatprep.mubr.bf16.mxu0 %v3429_v30 }
 0x131   : > { %1391 = vmatmul.mubr.bf16.gmra.mrb[56].mxu0 %v3431_v33 }
 0x132   : > { %1398 = vmatprep.mubr.bf16.mxu0 %v3432_v34 }
 0x139   : > { %1399 = vmatmul.mubr.bf16.gmra.mrb[60].mxu0 %v3434_v37 }
 0x194   : > { %v2784_v57 = vpop.f32.mrb[0].mxu0 }
 0x195   : > { %v2785_v59 = vpop.f32.mrb[1].mxu0 }
 0x196   : > { %v2786_v60 = vadd.f32 %v2785_v59, %v2784_v57  ;;  %v2787_v61 = vpop.f32.mrb[2].mxu0  ;;  %v2848_v62 = vpop.f32.mrb[0].mxu1 }
 0x197   : > { %v2788_v63 = vpop.f32.mrb[3].mxu0  ;;  %v2849_v2 = vpop.f32.mrb[1].mxu1 }
 0x198   : > { %v1151_v0 = vadd.f32 %v2786_v60, %v4061_v58  ;;  %v2789_v1 = vadd.f32 %v2788_v63, %v2787_v61  ;;  %v2850_v3 = vadd.f32 %v2849_v2, %v2848_v62  ;;  %v2851_v4 = vpop.f32.mrb[2].mxu1 }
 0x199   : > { %v2852_v6 = vpop.f32.mrb[3].mxu1 }
 0x19a   : > { %v1154_v5 = vadd.f32 %v2789_v1, %v4061_v58  ;;  %v4065_v7 = vadd.f32 %v2850_v3, %v1151_v0  ;;  %v2853_v8 = vadd.f32 %v2852_v6, %v2851_v4 }
 0x19c   : > { %v2790_v9 = vpop.f32.mrb[4].mxu0  ;;  %v4067_v10 = vadd.f32 %v2853_v8, %v1154_v5 }
 0x19d   : > { %v2791_v11 = vpop.f32.mrb[5].mxu0 }
 0x19e   : > { %v2792_v12 = vadd.f32 %v2791_v11, %v2790_v9  ;;  %v2793_v13 = vpop.f32.mrb[6].mxu0  ;;  %v2854_v14 = vpop.f32.mrb[4].mxu1 }
 0x19f   : > { %v2794_v15 = vpop.f32.mrb[7].mxu0  ;;  %v2855_v18 = vpop.f32.mrb[5].mxu1 }
 0x1a0   : > { %v1159_v16 = vadd.f32 %v2792_v12, %v4061_v58  ;;  %v2795_v17 = vadd.f32 %v2794_v15, %v2793_v13  ;;  %v2856_v19 = vadd.f32 %v2855_v18, %v2854_v14  ;;  %v2857_v20 = vpop.f32.mrb[6].mxu1 }
 0x1a1   : > { %v2858_v22 = vpop.f32.mrb[7].mxu1 }
 0x1a2   : > { %v1162_v21 = vadd.f32 %v2795_v17, %v4061_v58  ;;  %v4071_v23 = vadd.f32 %v2856_v19, %v1159_v16  ;;  %v2859_v24 = vadd.f32 %v2858_v22, %v2857_v20 }
 0x1a4   : > { %v2796_v25 = vpop.f32.mrb[8].mxu0  ;;  %v4073_v26 = vadd.f32 %v2859_v24, %v1162_v21 }
 0x1a5   : > { %v2797_v27 = vpop.f32.mrb[9].mxu0 }
 0x1a6   : > { %v2798_v28 = vadd.f32 %v2797_v27, %v2796_v25  ;;  %v2799_v29 = vpop.f32.mrb[10].mxu0  ;;  %v2860_v30 = vpop.f32.mrb[8].mxu1 }
 0x1a7   : > { %v2800_v31 = vpop.f32.mrb[11].mxu0  ;;  %v2861_v34 = vpop.f32.mrb[9].mxu1 }
 0x1a8   : > { %v1167_v32 = vadd.f32 %v2798_v28, %v4061_v58  ;;  %v2801_v33 = vadd.f32 %v2800_v31, %v2799_v29  ;;  %v2862_v35 = vadd.f32 %v2861_v34, %v2860_v30  ;;  %v2863_v36 = vpop.f32.mrb[10].mxu1 }
 0x1a9   : > { %v2864_v38 = vpop.f32.mrb[11].mxu1 }
 0x1aa   : > { %v1170_v37 = vadd.f32 %v2801_v33, %v4061_v58  ;;  %v4077_v39 = vadd.f32 %v2862_v35, %v1167_v32  ;;  %v2865_v40 = vadd.f32 %v2864_v38, %v2863_v36 }
 0x1ac   : > { %v2802_v41 = vpop.f32.mrb[12].mxu0  ;;  %v4079_v42 = vadd.f32 %v2865_v40, %v1170_v37 }
 0x1ad   : > { %v2803_v43 = vpop.f32.mrb[13].mxu0 }
 0x1ae   : > { %v2804_v44 = vadd.f32 %v2803_v43, %v2802_v41  ;;  %v2805_v45 = vpop.f32.mrb[14].mxu0  ;;  %v2866_v46 = vpop.f32.mrb[12].mxu1 }
 0x1af   : > { %v2806_v47 = vpop.f32.mrb[15].mxu0  ;;  %v2867_v50 = vpop.f32.mrb[13].mxu1 }
 0x1b0   : > { %v1175_v48 = vadd.f32 %v2804_v44, %v4061_v58  ;;  %v2807_v49 = vadd.f32 %v2806_v47, %v2805_v45  ;;  %v2868_v51 = vadd.f32 %v2867_v50, %v2866_v46  ;;  %v2869_v52 = vpop.f32.mrb[14].mxu1 }
 0x1b1   : > { %v2870_v54 = vpop.f32.mrb[15].mxu1 }
 0x1b2   : > { %v1178_v53 = vadd.f32 %v2807_v49, %v4061_v58  ;;  %v4083_v56 = vadd.f32 %v2868_v51, %v1175_v48  ;;  %v2871_v57 = vadd.f32 %v2870_v54, %v2869_v52 }
 0x1b4   : > { %v2808_v59 = vpop.f32.mrb[16].mxu0  ;;  %v4085_v60 = vadd.f32 %v2871_v57, %v1178_v53 }
 0x1b5   : > { %v2809_v61 = vpop.f32.mrb[17].mxu0 }
 0x1b6   : > { %v2810_v62 = vadd.f32 %v2809_v61, %v2808_v59  ;;  %v2811_v63 = vpop.f32.mrb[18].mxu0  ;;  %v2872_v0 = vpop.f32.mrb[16].mxu1 }
 0x1b7   : > { %v2812_v1 = vpop.f32.mrb[19].mxu0  ;;  %v2873_v4 = vpop.f32.mrb[17].mxu1 }
 0x1b8   : > { %v1183_v2 = vadd.f32 %v2810_v62, %v4061_v58  ;;  %v2813_v3 = vadd.f32 %v2812_v1, %v2811_v63  ;;  %v2874_v5 = vadd.f32 %v2873_v4, %v2872_v0  ;;  %v2875_v6 = vpop.f32.mrb[18].mxu1 }
 0x1b9   : > { %v2876_v9 = vpop.f32.mrb[19].mxu1 }
 0x1ba   : > { %v1186_v8 = vadd.f32 %v2813_v3, %v4061_v58  ;;  %v4089_v11 = vadd.f32 %v2874_v5, %v1183_v2  ;;  %v2877_v12 = vadd.f32 %v2876_v9, %v2875_v6 }
 0x1bc   : > { %v2814_v13 = vpop.f32.mrb[20].mxu0  ;;  %v4091_v14 = vadd.f32 %v2877_v12, %v1186_v8 }
 0x1bd   : > { %v2815_v15 = vpop.f32.mrb[21].mxu0 }
 0x1be   : > { %v2816_v16 = vadd.f32 %v2815_v15, %v2814_v13  ;;  %v2817_v17 = vpop.f32.mrb[22].mxu0  ;;  %v2878_v18 = vpop.f32.mrb[20].mxu1 }
 0x1bf   : > { %v2818_v19 = vpop.f32.mrb[23].mxu0  ;;  %v2879_v22 = vpop.f32.mrb[21].mxu1 }
 0x1c0   : > { %v1191_v20 = vadd.f32 %v2816_v16, %v4061_v58  ;;  %v2819_v21 = vadd.f32 %v2818_v19, %v2817_v17  ;;  %v2880_v24 = vadd.f32 %v2879_v22, %v2878_v18  ;;  %v2881_v25 = vpop.f32.mrb[22].mxu1 }
 0x1c1   : > { %v2882_v28 = vpop.f32.mrb[23].mxu1 }
 0x1c2   : > { %v1194_v27 = vadd.f32 %v2819_v21, %v4061_v58  ;;  %v4095_v29 = vadd.f32 %v2880_v24, %v1191_v20  ;;  %v2883_v30 = vadd.f32 %v2882_v28, %v2881_v25 }
 0x1c4   : > { %v2820_v31 = vpop.f32.mrb[24].mxu0  ;;  %v4097_v32 = vadd.f32 %v2883_v30, %v1194_v27 }
 0x1c5   : > { %v2821_v33 = vpop.f32.mrb[25].mxu0 }
 0x1c6   : > { %v2822_v34 = vadd.f32 %v2821_v33, %v2820_v31  ;;  %v2823_v35 = vpop.f32.mrb[26].mxu0  ;;  %v2884_v36 = vpop.f32.mrb[24].mxu1 }
 0x1c7   : > { %v2824_v37 = vpop.f32.mrb[27].mxu0  ;;  %v2885_v41 = vpop.f32.mrb[25].mxu1 }
 0x1c8   : > { %v1199_v38 = vadd.f32 %v2822_v34, %v4061_v58  ;;  %v2825_v40 = vadd.f32 %v2824_v37, %v2823_v35  ;;  %v2886_v43 = vadd.f32 %v2885_v41, %v2884_v36  ;;  %v2887_v44 = vpop.f32.mrb[26].mxu1 }
 0x1c9   : > { %v2888_v46 = vpop.f32.mrb[27].mxu1 }
 0x1ca   : > { %v1202_v45 = vadd.f32 %v2825_v40, %v4061_v58  ;;  %v4101_v47 = vadd.f32 %v2886_v43, %v1199_v38  ;;  %v2889_v48 = vadd.f32 %v2888_v46, %v2887_v44 }
 0x1cc   : > { %v2826_v49 = vpop.f32.mrb[28].mxu0  ;;  %v4103_v50 = vadd.f32 %v2889_v48, %v1202_v45 }
 0x1cd   : > { %v2827_v51 = vpop.f32.mrb[29].mxu0 }
 0x1ce   : > { %v2828_v52 = vadd.f32 %v2827_v51, %v2826_v49  ;;  %v2829_v53 = vpop.f32.mrb[30].mxu0  ;;  %v2890_v54 = vpop.f32.mrb[28].mxu1 }
 0x1cf   : > { %v2830_v57 = vpop.f32.mrb[31].mxu0  ;;  %v2891_v62 = vpop.f32.mrb[29].mxu1 }
 0x1d0   : > { %v1207_v59 = vadd.f32 %v2828_v52, %v4061_v58  ;;  %v2831_v61 = vadd.f32 %v2830_v57, %v2829_v53  ;;  %v2892_v63 = vadd.f32 %v2891_v62, %v2890_v54  ;;  %v2893_v0 = vpop.f32.mrb[30].mxu1 }
 0x1d1   : > { %v2894_v2 = vpop.f32.mrb[31].mxu1 }
 0x1d2   : > { %v1210_v1 = vadd.f32 %v2831_v61, %v4061_v58  ;;  %v4107_v3 = vadd.f32 %v2892_v63, %v1207_v59  ;;  %v2895_v4 = vadd.f32 %v2894_v2, %v2893_v0 }
 0x1d4   : > { %v2912_v5 = vpop.f32.mrb[32].mxu0  ;;  %v4109_v6 = vadd.f32 %v2895_v4, %v1210_v1 }
 0x1d5   : > { %v2913_v8 = vpop.f32.mrb[33].mxu0 }
 0x1d6   : > { %v2914_v9 = vadd.f32 %v2913_v8, %v2912_v5  ;;  %v2915_v12 = vpop.f32.mrb[34].mxu0 }
 0x1d7   : > { %v2916_v13 = vpop.f32.mrb[35].mxu0 }
 0x1d8   : > { %v4112_v15 = vadd.f32 %v2914_v9, %v4065_v7  ;;  %v2917_v16 = vadd.f32 %v2916_v13, %v2915_v12 }
 0x1da   : > { %v4115_v17 = vadd.f32 %v2917_v16, %v4067_v10 }
 0x1dc   : > { %v1407_v58 = vpack.c.bf16 %v4115_v17, %v4112_v15  ;;  %v2918_v18 = vpop.f32.mrb[36].mxu0 }
 0x1dd   : > { %v2919_v19 = vpop.f32.mrb[37].mxu0 }
 0x1de   : > { %v2920_v20 = vadd.f32 %v2919_v19, %v2918_v18  ;;  %v2921_v21 = vpop.f32.mrb[38].mxu0  ;;  %1625 = vmatmul.mubr.bf16.vlgmr.msra.gmra.mrb[32].mxu1 %v1407_v58  ;;  %3056 = vmatprep.mubr.bf16.mxu0 %v1407_v58 }
 0x1df   : > { %v2922_v22 = vpop.f32.mrb[39].mxu0  ;;  %1634 = vmatprep.mubr.bf16.mxu1 %v3712_v55 }
 0x1e0   : > { %v4121_v24 = vadd.f32 %v2920_v20, %v4071_v23  ;;  %v2923_v7 = vadd.f32 %v2922_v22, %v2921_v21  ;;  %v1449_v22 = vlaneseq }
 0x1e2   : > { %v4124_v25 = vadd.f32 %v2923_v7, %v4073_v26  ;;  %v1450_v7 = vshrl.u32 %v1449_v22, 7 }
 0x1e4   : > { %v2924_v10 = vpop.f32.mrb[40].mxu0  ;;  %v1408_v27 = vpack.c.bf16 %v4124_v25, %v4121_v24 }
 0x1e5   : > { %v2925_v28 = vpop.f32.mrb[41].mxu0 }
 0x1e6   : > { %v2926_v30 = vadd.f32 %v2925_v28, %v2924_v10  ;;  %v2927_v31 = vpop.f32.mrb[42].mxu0  ;;  %1635 = vmatmul.mubr.bf16.gmra.mrb[36].mxu1 %v1408_v27  ;;  %3057 = vmatmul.mubr.bf16.vlgmr.msra.gmra.mrb[64].mxu0 %v1408_v27  ;;  %v1451_v10 = vsub.s32 0, %v1450_v7  ;;  %v1447_v27 = vld [vmem:[%s4437_s4] sm:$0x7] }
 0x1e7   : > { %v2928_v33 = vpop.f32.mrb[43].mxu0  ;;  %1644 = vmatprep.mubr.bf16.mxu1 %v3712_v55 }
 0x1e8   : > { %v4130_v34 = vadd.f32 %v2926_v30, %v4077_v39  ;;  %v2929_v23 = vadd.f32 %v2928_v33, %v2927_v31  ;;  %v4185_v28 = vrot.slane %v1447_v27, %v1451_v10 }
 0x1ea   : > { %v4133_v35 = vadd.f32 %v2929_v23, %v4079_v42 }
 0x1ec   : > { %v2930_v26 = vpop.f32.mrb[44].mxu0  ;;  %v1409_v36 = vpack.c.bf16 %v4133_v35, %v4130_v34 }
 0x1ed   : > { %v2931_v37 = vpop.f32.mrb[45].mxu0 }
 0x1ee   : > { %v2932_v38 = vadd.f32 %v2931_v37, %v2930_v26  ;;  %v2933_v40 = vpop.f32.mrb[46].mxu0  ;;  %1645 = vmatmul.mubr.bf16.gmra.mrb[40].mxu1 %v1409_v36  ;;  %3060 = vmatprep.mubr.bf16.mxu0 %v1409_v36  ;;  %v1459_v36 = vsub.s32 2, %v1450_v7 }
 0x1ef   : > { %v2934_v41 = vpop.f32.mrb[47].mxu0  ;;  %1654 = vmatprep.mubr.bf16.mxu1 %v3712_v55 }
 0x1f0   : > { %v4139_v43 = vadd.f32 %v2932_v38, %v4083_v56  ;;  %v2935_v39 = vadd.f32 %v2934_v41, %v2933_v40 }
 0x1f2   : > { %v4142_v44 = vadd.f32 %v2935_v39, %v4085_v60  ;;  %v4193_v39 = vrot.slane %v1447_v27, %v1459_v36 }
 0x1f4   : > { %v2936_v42 = vpop.f32.mrb[48].mxu0  ;;  %v1410_v45 = vpack.c.bf16 %v4142_v44, %v4139_v43 }
 0x1f5   : > { %v2937_v46 = vpop.f32.mrb[49].mxu0 }
 0x1f6   : > { %v2938_v48 = vadd.f32 %v2937_v46, %v2936_v42  ;;  %v2939_v49 = vpop.f32.mrb[50].mxu0  ;;  %1655 = vmatmul.mubr.bf16.gmra.mrb[44].mxu1 %v1410_v45  ;;  %3061 = vmatmul.mubr.bf16.gmra.mrb[68].mxu0 %v1410_v45 }
 0x1f7   : > { %v2940_v51 = vpop.f32.mrb[51].mxu0  ;;  %1664 = vmatprep.mubr.bf16.mxu1 %v3712_v55 }
 0x1f8   : > { %v4148_v52 = vadd.f32 %v2938_v48, %v4089_v11  ;;  %v2941_v56 = vadd.f32 %v2940_v51, %v2939_v49 }
 0x1fa   : > { %v4151_v53 = vadd.f32 %v2941_v56, %v4091_v14 }
 0x1fc   : > { %v2942_v60 = vpop.f32.mrb[52].mxu0  ;;  %v1411_v54 = vpack.c.bf16 %v4151_v53, %v4148_v52 }
 0x1fd   : > { %v2943_v57 = vpop.f32.mrb[53].mxu0 }
 0x1fe   : > { %v2944_v59 = vadd.f32 %v2943_v57, %v2942_v60  ;;  %v2945_v61 = vpop.f32.mrb[54].mxu0  ;;  %1665 = vmatmul.mubr.bf16.gmra.mrb[48].mxu1 %v1411_v54  ;;  %3064 = vmatprep.mubr.bf16.mxu0 %v1411_v54 }
 0x1ff   : > { %v2946_v62 = vpop.f32.mrb[55].mxu0  ;;  %1674 = vmatprep.mubr.bf16.mxu1 %v3712_v55 }
 0x200   : > { %v4157_v63 = vadd.f32 %v2944_v59, %v4095_v29  ;;  %v2947_v11 = vadd.f32 %v2946_v62, %v2945_v61 }
 0x202   : > { %v4160_v0 = vadd.f32 %v2947_v11, %v4097_v32 }
 0x204   : > { %v2948_v14 = vpop.f32.mrb[56].mxu0  ;;  %v1412_v1 = vpack.c.bf16 %v4160_v0, %v4157_v63 }
 0x205   : > { %v2949_v2 = vpop.f32.mrb[57].mxu0 }
 0x206   : > { %v2950_v4 = vadd.f32 %v2949_v2, %v2948_v14  ;;  %v2951_v5 = vpop.f32.mrb[58].mxu0  ;;  %1675 = vmatmul.mubr.bf16.gmra.mrb[52].mxu1 %v1412_v1  ;;  %3065 = vmatmul.mubr.bf16.gmra.mrb[72].mxu0 %v1412_v1 }
 0x207   : > { %v2952_v8 = vpop.f32.mrb[59].mxu0  ;;  %1684 = vmatprep.mubr.bf16.mxu1 %v3712_v55 }
 0x208   : > { %v4166_v9 = vadd.f32 %v2950_v4, %v4101_v47  ;;  %v2953_v29 = vadd.f32 %v2952_v8, %v2951_v5 }
 0x20a   : > { %v4169_v12 = vadd.f32 %v2953_v29, %v4103_v50 }
 0x20c   : > { %v2954_v32 = vpop.f32.mrb[60].mxu0  ;;  %v1413_v13 = vpack.c.bf16 %v4169_v12, %v4166_v9 }
 0x20d   : > { %v2955_v16 = vpop.f32.mrb[61].mxu0 }
 0x20e   : > { %v2956_v58 = vadd.f32 %v2955_v16, %v2954_v32  ;;  %v2957_v18 = vpop.f32.mrb[62].mxu0  ;;  %1685 = vmatmul.mubr.bf16.gmra.mrb[56].mxu1 %v1413_v13  ;;  %3068 = vmatprep.mubr.bf16.mxu0 %v1413_v13 }
 0x20f   : > { %v2958_v19 = vpop.f32.mrb[63].mxu0  ;;  %1694 = vmatprep.mubr.bf16.mxu1 %v3712_v55  ;;  %v1455_v55 = vsub.s32 1, %v1450_v7 }
 0x210   : > { %v4175_v20 = vadd.f32 %v2956_v58, %v4107_v3  ;;  %v2959_v47 = vadd.f32 %v2958_v19, %v2957_v18 }
 0x211   : > { %v4187_v30 = vrot.slane %v1447_v27, %v1455_v55 }
 0x212   : > { %v4178_v21 = vadd.f32 %v2959_v47, %v4109_v6 }
 0x214   : > { %v1414_v50 = vpack.c.bf16 %v4178_v21, %v4175_v20 }
 0x216   : > { %1695 = vmatmul.mubr.bf16.gmra.mrb[60].mxu1 %v1414_v50  ;;  %3069 = vmatmul.mubr.bf16.gmra.mrb[76].mxu0 %v1414_v50 }
 0x2b1   : > { %v1626_v3 = vpop.f32.mrb[32].mxu1 }
 0x2b2   : > { %v1628_v6 = vpop.f32.mrb[33].mxu1  ;;  %v1627_v33 = vadd.f32 %v1626_v3, %v4185_v28 }
 0x2b3   : > { %v1630_v31 = vpop.f32.mrb[34].mxu1  ;;  %v1629_v37 = vadd.f32 %v1628_v6, %v4187_v30 }
 0x2b4   : > { %v1631_v23 = vadd.f32 %v1630_v31, %v4185_v28  ;;  %v1632_v26 = vpop.f32.mrb[35].mxu1 }
 0x2b5   : > { %v1633_v38 = vadd.f32 %v1632_v26, %v4187_v30 }
 0x2b6   : > { %v1802_v40 = vpack.c.bf16 %v1631_v23, %v1627_v33 }
 0x2b7   : > { %v1803_v41 = vpack.c.bf16 %v1633_v38, %v1629_v37 }
 0x2b8   : > { %3120 = vmatprep.mubr.bf16.mxu0 %v1802_v40 }
 0x2b9   : > { %v1636_v42 = vpop.f32.mrb[36].mxu1  ;;  %v3058_v45 = vpop.f32.mrb[64].mxu0  ;;  %1826 = vxpose.xlu0.c.b16.start [1/8] %v1803_v41, 128 }
 0x2ba   : > { %v4196_v46 = vadd.f32 %v1636_v42, %v4185_v28  ;;  %v1638_v48 = vpop.f32.mrb[37].mxu1  ;;  %v1739_v49 = vpop.f32.mrb[65].mxu0  ;;  %v1748_v60 = vadd.f32 %v3058_v45, %v4193_v39 }
 0x2bb   : > { %v1640_v51 = vpop.f32.mrb[38].mxu1  ;;  %v3059_v56 = vpop.f32.mrb[66].mxu0  ;;  %v1639_v62 = vadd.f32 %v1638_v48, %v4187_v30  ;;  %v1740_v11 = vadd.f32 %v1739_v49, %v4193_v39 }
 0x2bc   : > { %v4200_v54 = vadd.f32 %v1640_v51, %v4185_v28  ;;  %v1751_v57 = vadd.f32 %v3059_v56, %v4193_v39  ;;  %v1642_v59 = vpop.f32.mrb[39].mxu1  ;;  %v1742_v61 = vpop.f32.mrb[67].mxu0 }
 0x2bd   : > { %v1643_v14 = vadd.f32 %v1642_v59, %v4187_v30  ;;  %v1743_v1 = vadd.f32 %v1742_v61, %v4193_v39 }
 0x2be   : > { %v1805_v2 = vpack.c.bf16 %v4200_v54, %v4196_v46  ;;  %v1807_v4 = vpack.c.bf16 %v1751_v57, %v1748_v60  ;;  %v3473_v46 = vld [vmem:[#allocation8 + $0x30] sm:$0xff]   ;;  %v3474_v54 = vld [vmem:[#allocation8 + $0x38] sm:$0xff]  }
 0x2bf   : > { %v1804_v5 = vpack.c.bf16 %v1743_v1, %v1740_v11  ;;  %v1806_v8 = vpack.c.bf16 %v1643_v14, %v1639_v62 }
 0x2c1   : > { %v1646_v29 = vpop.f32.mrb[40].mxu1  ;;  %1827 = vxpose.xlu0.c.b16.cont [2/8] %v1806_v8, 128  ;;  %3072 = vmatprep.subr.bf16.mxu1 %v1804_v5 }
 0x2c2   : > { %v4210_v32 = vadd.f32 %v1646_v29, %v4185_v28  ;;  %v1648_v13 = vpop.f32.mrb[41].mxu1  ;;  %3073 = vmatpush3.bf16.msra.mxu1 %v1804_v5 }
 0x2c3   : > { %v1650_v16 = vpop.f32.mrb[42].mxu1  ;;  %3074 = vmatprep.subr.bf16.mxu1 %v1807_v4  ;;  %v1649_v19 = vadd.f32 %v1648_v13, %v4187_v30 }
 0x2c4   : > { %v4213_v58 = vadd.f32 %v1650_v16, %v4185_v28  ;;  %v1652_v18 = vpop.f32.mrb[43].mxu1 }
 0x2c5   : > { %v1653_v47 = vadd.f32 %v1652_v18, %v4187_v30 }
 0x2c6   : > { %v1808_v50 = vpack.c.bf16 %v4213_v58, %v4210_v32  ;;  %3075 = vmatpush3.bf16.msra.mxu1 %v1807_v4  ;;  %v3476_v32 = vld [vmem:[#allocation10 + $0x8] sm:$0xff]   ;;  %v3477_v58 = vld [vmem:[#allocation10 + $0x10] sm:$0xff]  }
 0x2c7   : > { %v1809_v22 = vpack.c.bf16 %v1653_v47, %v1649_v19 }
 0x2c9   : > { %v1656_v7 = vpop.f32.mrb[44].mxu1  ;;  %v3062_v10 = vpop.f32.mrb[68].mxu0  ;;  %1828 = vxpose.xlu0.c.b16.cont [3/8] %v1809_v22, 128 }
 0x2ca   : > { %v4220_v27 = vadd.f32 %v1656_v7, %v4185_v28  ;;  %v1658_v55 = vpop.f32.mrb[45].mxu1  ;;  %v1755_v3 = vpop.f32.mrb[69].mxu0  ;;  %v1764_v33 = vadd.f32 %v3062_v10, %v4193_v39 }
 0x2cb   : > { %v1660_v6 = vpop.f32.mrb[46].mxu1  ;;  %v3063_v31 = vpop.f32.mrb[70].mxu0  ;;  %v1659_v38 = vadd.f32 %v1658_v55, %v4187_v30  ;;  %v1756_v40 = vadd.f32 %v1755_v3, %v4193_v39 }
 0x2cc   : > { %v4224_v23 = vadd.f32 %v1660_v6, %v4185_v28  ;;  %v1767_v26 = vadd.f32 %v3063_v31, %v4193_v39  ;;  %v1662_v36 = vpop.f32.mrb[47].mxu1  ;;  %v1758_v37 = vpop.f32.mrb[71].mxu0 }
 0x2cd   : > { %v1663_v41 = vadd.f32 %v1662_v36, %v4187_v30  ;;  %v1759_v42 = vadd.f32 %v1758_v37, %v4193_v39 }
 0x2ce   : > { %v1811_v45 = vpack.c.bf16 %v4224_v23, %v4220_v27  ;;  %v1813_v48 = vpack.c.bf16 %v1767_v26, %v1764_v33  ;;  %v3479_v27 = vld [vmem:[#allocation10 + $0x20] sm:$0xff]  }
 0x2cf   : > { %v1810_v49 = vpack.c.bf16 %v1759_v42, %v1756_v40  ;;  %v1812_v51 = vpack.c.bf16 %v1663_v41, %v1659_v38 }
 0x2d1   : > { %v1666_v56 = vpop.f32.mrb[48].mxu1  ;;  %1829 = vxpose.xlu0.c.b16.cont [4/8] %v1812_v51, 128  ;;  %3076 = vmatprep.subr.bf16.mxu1 %v1810_v49 }
 0x2d2   : > { %v4234_v60 = vadd.f32 %v1666_v56, %v4185_v28  ;;  %v1668_v57 = vpop.f32.mrb[49].mxu1  ;;  %3077 = vmatpush3.bf16.msra.mxu1 %v1810_v49 }
 0x2d3   : > { %v1670_v59 = vpop.f32.mrb[50].mxu1  ;;  %3078 = vmatprep.subr.bf16.mxu1 %v1813_v48  ;;  %v1669_v11 = vadd.f32 %v1668_v57, %v4187_v30 }
 0x2d4   : > { %v4237_v61 = vadd.f32 %v1670_v59, %v4185_v28  ;;  %v1672_v62 = vpop.f32.mrb[51].mxu1 }
 0x2d5   : > { %v1673_v14 = vadd.f32 %v1672_v62, %v4187_v30 }
 0x2d6   : > { %v1814_v1 = vpack.c.bf16 %v4237_v61, %v4234_v60  ;;  %3079 = vmatpush3.bf16.msra.mxu1 %v1813_v48 }
 0x2d7   : > { %v1815_v4 = vpack.c.bf16 %v1673_v14, %v1669_v11 }
 0x2d9   : > { %v1676_v5 = vpop.f32.mrb[52].mxu1  ;;  %v3066_v8 = vpop.f32.mrb[72].mxu0  ;;  %1830 = vxpose.xlu0.c.b16.cont [5/8] %v1815_v4, 128 }
 0x2da   : > { %v4244_v29 = vadd.f32 %v1676_v5, %v4185_v28  ;;  %v1678_v13 = vpop.f32.mrb[53].mxu1  ;;  %v1771_v16 = vpop.f32.mrb[73].mxu0  ;;  %v1780_v47 = vadd.f32 %v3066_v8, %v4193_v39 }
 0x2db   : > { %v1680_v18 = vpop.f32.mrb[54].mxu1  ;;  %v3067_v19 = vpop.f32.mrb[74].mxu0  ;;  %v1679_v3 = vadd.f32 %v1678_v13, %v4187_v30  ;;  %v1772_v6 = vadd.f32 %v1771_v16, %v4193_v39 }
 0x2dc   : > { %v4248_v22 = vadd.f32 %v1680_v18, %v4185_v28  ;;  %v1783_v7 = vadd.f32 %v3067_v19, %v4193_v39  ;;  %v1682_v10 = vpop.f32.mrb[55].mxu1  ;;  %v1774_v55 = vpop.f32.mrb[75].mxu0 }
 0x2dd   : > { %v1683_v31 = vadd.f32 %v1682_v10, %v4187_v30  ;;  %v1775_v33 = vadd.f32 %v1774_v55, %v4193_v39 }
 0x2de   : > { %v1817_v26 = vpack.c.bf16 %v4248_v22, %v4244_v29  ;;  %v1819_v36 = vpack.c.bf16 %v1783_v7, %v1780_v47 }
 0x2df   : > { %v1816_v37 = vpack.c.bf16 %v1775_v33, %v1772_v6  ;;  %v1818_v38 = vpack.c.bf16 %v1683_v31, %v1679_v3 }
 0x2e1   : > { %v1686_v40 = vpop.f32.mrb[56].mxu1  ;;  %1831 = vxpose.xlu0.c.b16.cont [6/8] %v1818_v38, 128  ;;  %3080 = vmatprep.subr.bf16.mxu1 %v1816_v37 }
 0x2e2   : > { %v4258_v41 = vadd.f32 %v1686_v40, %v4185_v28  ;;  %v1688_v42 = vpop.f32.mrb[57].mxu1  ;;  %3081 = vmatpush3.bf16.msra.mxu1 %v1816_v37 }
 0x2e3   : > { %v1690_v48 = vpop.f32.mrb[58].mxu1  ;;  %3082 = vmatprep.subr.bf16.mxu1 %v1819_v36  ;;  %v1689_v56 = vadd.f32 %v1688_v42, %v4187_v30 }
 0x2e4   : > { %v4261_v49 = vadd.f32 %v1690_v48, %v4185_v28  ;;  %v1692_v51 = vpop.f32.mrb[59].mxu1 }
 0x2e5   : > { %v1693_v57 = vadd.f32 %v1692_v51, %v4187_v30 }
 0x2e6   : > { %v1820_v59 = vpack.c.bf16 %v4261_v49, %v4258_v41  ;;  %3083 = vmatpush3.bf16.msra.mxu1 %v1819_v36 }
 0x2e7   : > { %v1821_v62 = vpack.c.bf16 %v1693_v57, %v1689_v56  ;;  %v3467_v57 = vld [vmem:[#allocation8] sm:$0xff]  }
 0x2e9   : > { %v1696_v11 = vpop.f32.mrb[60].mxu1  ;;  %v3070_v14 = vpop.f32.mrb[76].mxu0  ;;  %1832 = vxpose.xlu0.c.b16.cont [7/8] %v1821_v62, 128  ;;  %v3468_v62 = vld [vmem:[#allocation8 + $0x8] sm:$0xff]  }
 0x2ea   : > { %v4268_v4 = vadd.f32 %v1696_v11, %v4185_v28  ;;  %v1698_v5 = vpop.f32.mrb[61].mxu1  ;;  %v1787_v8 = vpop.f32.mrb[77].mxu0  ;;  %v1796_v18 = vadd.f32 %v3070_v14, %v4193_v39  ;;  %v3469_v11 = vld [vmem:[#allocation8 + $0x10] sm:$0xff]   ;;  %v3470_v14 = vld [vmem:[#allocation8 + $0x18] sm:$0xff]  }
 0x2eb   : > { %v1700_v13 = vpop.f32.mrb[62].mxu1  ;;  %v3071_v16 = vpop.f32.mrb[78].mxu0  ;;  %v1699_v55 = vadd.f32 %v1698_v5, %v4187_v30  ;;  %v1788_v3 = vadd.f32 %v1787_v8, %v4193_v39  ;;  %v3471_v5 = vld [vmem:[#allocation8 + $0x20] sm:$0xff]   ;;  %v3472_v8 = vld [vmem:[#allocation8 + $0x28] sm:$0xff]  }
 0x2ec   : > { %v4272_v19 = vadd.f32 %v1700_v13, %v4185_v28  ;;  %v1799_v47 = vadd.f32 %v3071_v16, %v4193_v39  ;;  %v1702_v7 = vpop.f32.mrb[63].mxu1  ;;  %v1790_v10 = vpop.f32.mrb[79].mxu0 }
 0x2ed   : > { %v1703_v6 = vadd.f32 %v1702_v7, %v4187_v30  ;;  %v1791_v31 = vadd.f32 %v1790_v10, %v4193_v39 }
 0x2ee   : > { %v1823_v33 = vpack.c.bf16 %v4272_v19, %v4268_v4  ;;  %v1825_v36 = vpack.c.bf16 %v1799_v47, %v1796_v18 }
 0x2ef   : > { %v1822_v37 = vpack.c.bf16 %v1791_v31, %v1788_v3  ;;  %v1824_v38 = vpack.c.bf16 %v1703_v6, %v1699_v55 }
 0x2f1   : > { %1833 = vxpose.xlu0.c.b16.end [8/8] %v1824_v38, 128  ;;  %3084 = vmatprep.subr.bf16.mxu1 %v1822_v37 }
 0x2f2   : > { %3085 = vmatpush3.bf16.msra.mxu1 %v1822_v37 }
 0x2f3   : > { %3086 = vmatprep.subr.bf16.mxu1 %v1825_v36 }
 0x2f6   : > { %3087 = vmatpush3.bf16.msra.mxu1 %v1825_v36 }
 0x2f7   : > { %3136 = vmatprep.subr.bf16.mxu1 %v3467_v57 }
 0x33b   : > { %v1834_v28 = vpop.trf.xlu0 }
 0x33c   : > { %3088 = vmatprep.mubr.bf16.mxu1 %v1834_v28 }
 0x33f   : > { %v1835_v40 = vpop.trf.xlu0 }
 0x340   : > { %3089 = vmatmul.mubr.bf16.vlgmr.msra.gmra.mrb[64].mxu1 %v1835_v40 }
 0x341   : > { %3137 = vmatpush3.bf16.msra.mxu1 %v3467_v57 }
 0x342   : > { %3138 = vmatprep.subr.bf16.mxu1 %v3468_v62 }
 0x343   : > { %v1836_v42 = vpop.trf.xlu0 }
 0x344   : > { %3092 = vmatprep.mubr.bf16.mxu1 %v1836_v42 }
 0x345   : > { %3139 = vmatpush3.bf16.msra.mxu1 %v3468_v62 }
 0x346   : > { %3140 = vmatprep.subr.bf16.mxu1 %v3469_v11 }
 0x347   : > { %v1837_v30 = vpop.trf.xlu0 }
 0x348   : > { %3093 = vmatmul.mubr.bf16.gmra.mrb[68].mxu1 %v1837_v30 }
 0x349   : > { %3141 = vmatpush3.bf16.msra.mxu1 %v3469_v11 }
 0x34a   : > { %3142 = vmatprep.subr.bf16.mxu1 %v3470_v14 }
 0x34b   : > { %v1838_v39 = vpop.trf.xlu0 }
 0x34c   : > { %3096 = vmatprep.mubr.bf16.mxu1 %v1838_v39 }
 0x34d   : > { %3143 = vmatpush3.bf16.msra.mxu1 %v3470_v14 }
 0x34e   : > { %3144 = vmatprep.subr.bf16.mxu1 %v3471_v5 }
 0x34f   : > { %v1839_v48 = vpop.trf.xlu0 }
 0x350   : > { %3097 = vmatmul.mubr.bf16.gmra.mrb[72].mxu1 %v1839_v48 }
 0x351   : > { %3145 = vmatpush3.bf16.msra.mxu1 %v3471_v5 }
 0x352   : > { %3146 = vmatprep.subr.bf16.mxu1 %v3472_v8 }
 0x353   : > { %v1840_v51 = vpop.trf.xlu0 }
 0x354   : > { %3100 = vmatprep.mubr.bf16.mxu1 %v1840_v51 }
 0x355   : > { %3147 = vmatpush3.bf16.msra.mxu1 %v3472_v8 }
 0x356   : > { %3148 = vmatprep.subr.bf16.mxu1 %v3473_v46 }
 0x357   : > { %v1841_v56 = vpop.trf.xlu0 }
 0x358   : > { %3101 = vmatmul.mubr.bf16.gmra.mrb[76].mxu1 %v1841_v56 }
 0x359   : > { %3149 = vmatpush3.bf16.msra.mxu1 %v3473_v46  ;;  %v3481_v46 = vld [vmem:[#allocation10 + $0x30] sm:$0xff]  }
 0x35a   : > { %3150 = vmatprep.subr.bf16.mxu1 %v3474_v54 }
 0x35d   : > { %3151 = vmatpush3.bf16.msra.mxu1 %v3474_v54  ;;  %v3482_v54 = vld [vmem:[#allocation10 + $0x38] sm:$0xff]  }
 0x413   : > { %v3090_v13 = vpop.f32.mrb[64].mxu1 }
 0x414   : > { %v1876_v16 = vpop.f32.mrb[65].mxu1 }
 0x415   : > { %v3091_v18 = vpop.f32.mrb[66].mxu1 }
 0x416   : > { %v1940_v47 = vpack.c.bf16 %v3091_v18, %v3090_v13  ;;  %v1879_v7 = vpop.f32.mrb[67].mxu1 }
 0x417   : > { %v1939_v10 = vpack.c.bf16 %v1879_v7, %v1876_v16 }
 0x419   : > { %3104 = vmatprep.subr.bf16.mxu0 %v1939_v10 }
 0x41a   : > { %3105 = vmatpush3.bf16.msra.mxu0 %v1939_v10 }
 0x41b   : > { %v3094_v55 = vpop.f32.mrb[68].mxu1  ;;  %3106 = vmatprep.subr.bf16.mxu0 %v1940_v47 }
 0x41c   : > { %v1892_v3 = vpop.f32.mrb[69].mxu1 }
 0x41d   : > { %v3095_v6 = vpop.f32.mrb[70].mxu1 }
 0x41e   : > { %v1942_v31 = vpack.c.bf16 %v3095_v6, %v3094_v55  ;;  %v1895_v36 = vpop.f32.mrb[71].mxu1  ;;  %3107 = vmatpush3.bf16.msra.mxu0 %v1940_v47 }
 0x41f   : > { %v1941_v37 = vpack.c.bf16 %v1895_v36, %v1892_v3 }
 0x421   : > { %3108 = vmatprep.subr.bf16.mxu0 %v1941_v37 }
 0x422   : > { %3109 = vmatpush3.bf16.msra.mxu0 %v1941_v37 }
 0x423   : > { %v3098_v38 = vpop.f32.mrb[72].mxu1  ;;  %3110 = vmatprep.subr.bf16.mxu0 %v1942_v31 }
 0x424   : > { %v1908_v28 = vpop.f32.mrb[73].mxu1 }
 0x425   : > { %v3099_v40 = vpop.f32.mrb[74].mxu1 }
 0x426   : > { %v1944_v42 = vpack.c.bf16 %v3099_v40, %v3098_v38  ;;  %v1911_v30 = vpop.f32.mrb[75].mxu1  ;;  %3111 = vmatpush3.bf16.msra.mxu0 %v1942_v31 }
 0x427   : > { %v1943_v39 = vpack.c.bf16 %v1911_v30, %v1908_v28 }
 0x429   : > { %3112 = vmatprep.subr.bf16.mxu0 %v1943_v39 }
 0x42a   : > { %3113 = vmatpush3.bf16.msra.mxu0 %v1943_v39 }
 0x42b   : > { %v3102_v48 = vpop.f32.mrb[76].mxu1  ;;  %3114 = vmatprep.subr.bf16.mxu0 %v1944_v42 }
 0x42c   : > { %v1924_v51 = vpop.f32.mrb[77].mxu1 }
 0x42d   : > { %v3103_v56 = vpop.f32.mrb[78].mxu1 }
 0x42e   : > { %v1946_v57 = vpack.c.bf16 %v3103_v56, %v3102_v48  ;;  %v1927_v62 = vpop.f32.mrb[79].mxu1  ;;  %3115 = vmatpush3.bf16.msra.mxu0 %v1944_v42 }
 0x42f   : > { %v1945_v11 = vpack.c.bf16 %v1927_v62, %v1924_v51 }
 0x431   : > { %3116 = vmatprep.subr.bf16.mxu0 %v1945_v11 }
 0x432   : > { %3117 = vmatpush3.bf16.msra.mxu0 %v1945_v11  ;;  %v3480_v11 = vld [vmem:[#allocation10 + $0x28] sm:$0xff]  }
 0x433   : > { %3118 = vmatprep.subr.bf16.mxu0 %v1946_v57 }
 0x436   : > { %3119 = vmatpush3.bf16.msra.mxu0 %v1946_v57 }
 0x439   : > { %3121 = vmatmul.mubr.bf16.vlgmr.msra.gmra.mrb[80].mxu0 %v1805_v2  ;;  %v3475_v2 = vld [vmem:[#allocation10] sm:$0xff]  }
 0x43a   : > { %3124 = vmatprep.mubr.bf16.mxu0 %v1808_v50  ;;  %3168 = vmatprep.subr.bf16.mxu0 %v3475_v2  ;;  %v3478_v50 = vld [vmem:[#allocation10 + $0x18] sm:$0xff]  }
 0x43b   : > { %3200 = vmatprep.subr.bf16.mxu1 %v3475_v2  ;;  %3169 = vmatpush3.bf16.msra.mxu0 %v3475_v2 }
 0x43c   : > { %3170 = vmatprep.subr.bf16.mxu0 %v3476_v32 }
 0x43f   : > { %3171 = vmatpush3.bf16.msra.mxu0 %v3476_v32 }
 0x440   : > { %3172 = vmatprep.subr.bf16.mxu0 %v3477_v58 }
 0x441   : > { %3125 = vmatmul.mubr.bf16.gmra.mrb[84].mxu0 %v1811_v45 }
 0x442   : > { %3128 = vmatprep.mubr.bf16.mxu0 %v1814_v1 }
 0x443   : > { %3173 = vmatpush3.bf16.msra.mxu0 %v3477_v58 }
 0x444   : > { %3174 = vmatprep.subr.bf16.mxu0 %v3478_v50 }
 0x447   : > { %3175 = vmatpush3.bf16.msra.mxu0 %v3478_v50 }
 0x448   : > { %3176 = vmatprep.subr.bf16.mxu0 %v3479_v27 }
 0x449   : > { %3129 = vmatmul.mubr.bf16.gmra.mrb[88].mxu0 %v1817_v26 }
 0x44a   : > { %3132 = vmatprep.mubr.bf16.mxu0 %v1820_v59 }
 0x44b   : > { %3177 = vmatpush3.bf16.msra.mxu0 %v3479_v27 }
 0x44c   : > { %3178 = vmatprep.subr.bf16.mxu0 %v3480_v11 }
 0x44f   : > { %3179 = vmatpush3.bf16.msra.mxu0 %v3480_v11 }
 0x450   : > { %3180 = vmatprep.subr.bf16.mxu0 %v3481_v46 }
 0x451   : > { %3133 = vmatmul.mubr.bf16.gmra.mrb[92].mxu0 %v1823_v33 }
 0x453   : > { %3181 = vmatpush3.bf16.msra.mxu0 %v3481_v46 }
 0x454   : > { %3182 = vmatprep.subr.bf16.mxu0 %v3482_v54 }
 0x457   : > { %3183 = vmatpush3.bf16.msra.mxu0 %v3482_v54 }
 0x50c   : > { %v3122_v23 = vpop.f32.mrb[80].mxu0 }
 0x50d   : > { %v1981_v45 = vpop.f32.mrb[81].mxu0  ;;  %v2046_v61 = vmul.f32 0.0078125, %v3122_v23 }
 0x50e   : > { %v3123_v60 = vpop.f32.mrb[82].mxu0  ;;  %v2044_v22 = vmul.f32 0.0078125, %v1981_v45 }
 0x50f   : > { %v2047_v1 = vmul.f32 0.0078125, %v3123_v60  ;;  %v1984_v29 = vpop.f32.mrb[83].mxu0 }
 0x510   : > { %v2045_v26 = vmul.f32 0.0078125, %v1984_v29 }
 0x511   : > { %v2061_v41 = vpack.c.bf16 %v2047_v1, %v2046_v61 }
 0x512   : > { %v2060_v49 = vpack.c.bf16 %v2045_v26, %v2044_v22 }
 0x514   : > { %v3126_v59 = vpop.f32.mrb[84].mxu0  ;;  %3152 = vmatprep.mubr.bf16.mxu1 %v2060_v49 }
 0x515   : > { %v1997_v4 = vpop.f32.mrb[85].mxu0  ;;  %3153 = vmatmul.mubr.bf16.vlgmr.msra.gmra.mrb[80].mxu1 %v2061_v41  ;;  %v2050_v33 = vmul.f32 0.0078125, %v3126_v59 }
 0x516   : > { %v3127_v19 = vpop.f32.mrb[86].mxu0  ;;  %3208 = vmatpush3.bf16.msra.mxu1 %v3475_v2  ;;  %v2048_v8 = vmul.f32 0.0078125, %v1997_v4  ;;  %v4305_v2 = vld [vmem:[%s4439_s6] ss:$0 sm:$0xff] }
 0x517   : > { %v2051_v14 = vmul.f32 0.0078125, %v3127_v19  ;;  %v2000_v5 = vpop.f32.mrb[87].mxu0  ;;  %3201 = vmatprep.subr.bf16.mxu1 %v3476_v32 }
 0x518   : > { %v2049_v13 = vmul.f32 0.0078125, %v2000_v5 }
 0x519   : > { %v2063_v16 = vpack.c.bf16 %v2051_v14, %v2050_v33 }
 0x51a   : > { %v2062_v18 = vpack.c.bf16 %v2049_v13, %v2048_v8  ;;  %3209 = vmatpush3.bf16.msra.mxu1 %v3476_v32 }
 0x51b   : > { %3202 = vmatprep.subr.bf16.mxu1 %v3477_v58 }
 0x51c   : > { %v3130_v47 = vpop.f32.mrb[88].mxu0  ;;  %3156 = vmatprep.mubr.bf16.mxu1 %v2062_v18 }
 0x51d   : > { %v2013_v7 = vpop.f32.mrb[89].mxu0  ;;  %3157 = vmatmul.mubr.bf16.gmra.mrb[84].mxu1 %v2063_v16  ;;  %v2054_v55 = vmul.f32 0.0078125, %v3130_v47 }
 0x51e   : > { %v3131_v10 = vpop.f32.mrb[90].mxu0  ;;  %3210 = vmatpush3.bf16.msra.mxu1 %v3477_v58  ;;  %v2052_v31 = vmul.f32 0.0078125, %v2013_v7  ;;  %v4310_v58 = vld [vmem:[%s4440_s7] ss:$0 sm:$0xff] }
 0x51f   : > { %v2055_v3 = vmul.f32 0.0078125, %v3131_v10  ;;  %v2016_v6 = vpop.f32.mrb[91].mxu0  ;;  %3203 = vmatprep.subr.bf16.mxu1 %v3478_v50 }
 0x520   : > { %v2053_v36 = vmul.f32 0.0078125, %v2016_v6 }
 0x521   : > { %v2065_v37 = vpack.c.bf16 %v2055_v3, %v2054_v55 }
 0x522   : > { %v2064_v38 = vpack.c.bf16 %v2053_v36, %v2052_v31  ;;  %3211 = vmatpush3.bf16.msra.mxu1 %v3478_v50 }
 0x523   : > { %3204 = vmatprep.subr.bf16.mxu1 %v3479_v27 }
 0x524   : > { %v3134_v28 = vpop.f32.mrb[92].mxu0  ;;  %3160 = vmatprep.mubr.bf16.mxu1 %v2064_v38 }
 0x525   : > { %v2029_v40 = vpop.f32.mrb[93].mxu0  ;;  %3161 = vmatmul.mubr.bf16.gmra.mrb[88].mxu1 %v2065_v37  ;;  %v2058_v30 = vmul.f32 0.0078125, %v3134_v28 }
 0x526   : > { %v3135_v42 = vpop.f32.mrb[94].mxu0  ;;  %3212 = vmatpush3.bf16.msra.mxu1 %v3479_v27  ;;  %v2056_v51 = vmul.f32 0.0078125, %v2029_v40 }
 0x527   : > { %v2059_v39 = vmul.f32 0.0078125, %v3135_v42  ;;  %v2032_v48 = vpop.f32.mrb[95].mxu0  ;;  %3205 = vmatprep.subr.bf16.mxu1 %v3480_v11 }
 0x528   : > { %v2057_v56 = vmul.f32 0.0078125, %v2032_v48 }
 0x529   : > { %v2067_v57 = vpack.c.bf16 %v2059_v39, %v2058_v30 }
 0x52a   : > { %v2066_v62 = vpack.c.bf16 %v2057_v56, %v2056_v51  ;;  %3213 = vmatpush3.bf16.msra.mxu1 %v3480_v11 }
 0x52b   : > { %3206 = vmatprep.subr.bf16.mxu1 %v3481_v46 }
 0x52c   : > { %3164 = vmatprep.mubr.bf16.mxu1 %v2066_v62 }
 0x52d   : > { %3165 = vmatmul.mubr.bf16.gmra.mrb[92].mxu1 %v2067_v57 }
 0x52e   : > { %3214 = vmatpush3.bf16.msra.mxu1 %v3481_v46 }
 0x52f   : > { %3207 = vmatprep.subr.bf16.mxu1 %v3482_v54 }
 0x532   : > { %3215 = vmatpush3.bf16.msra.mxu1 %v3482_v54 }
 0x5e8   : > { %v3154_v32 = vpop.f32.mrb[80].mxu1 }
 0x5e9   : > { %v2238_v50 = vmul.f32 %v3154_v32, %v4305_v2  ;;  %v2166_v27 = vpop.f32.mrb[81].mxu1 }
 0x5ea   : > { %v2236_v23 = vmul.f32 %v4305_v2, %v2166_v27  ;;  %v3155_v45 = vpop.f32.mrb[82].mxu1 }
 0x5eb   : > { %v2261_v60 = vadd.f32 %v4310_v58, %v2238_v50  ;;  %v2239_v61 = vmul.f32 %v3155_v45, %v4305_v2  ;;  %v2169_v1 = vpop.f32.mrb[83].mxu1 }
 0x5ec   : > { %v2259_v29 = vadd.f32 %v4310_v58, %v2236_v23  ;;  %v2237_v22 = vmul.f32 %v4305_v2, %v2169_v1 }
 0x5ed   : > { %v2262_v26 = vadd.f32 %v4310_v58, %v2239_v61  ;;  %v2277_v49 = vadd.f32 %v2261_v60, %v4121_v24 }
 0x5ee   : > { %v2260_v41 = vadd.f32 %v4310_v58, %v2237_v22  ;;  %v2275_v4 = vadd.f32 %v2259_v29, %v4112_v15 }
 0x5ef   : > { %v2278_v59 = vadd.f32 %v2262_v26, %v4124_v25 }
 0x5f0   : > { %v2276_v19 = vadd.f32 %v2260_v41, %v4115_v17  ;;  %v3158_v33 = vpop.f32.mrb[84].mxu1 }
 0x5f1   : > { %v2292_v14 = vpack.c.bf16 %v2278_v59, %v2277_v49  ;;  %v2242_v5 = vmul.f32 %v3158_v33, %v4305_v2  ;;  %v2182_v8 = vpop.f32.mrb[85].mxu1 }
 0x5f2   : > { %v2240_v13 = vmul.f32 %v4305_v2, %v2182_v8  ;;  %v3159_v16 = vpop.f32.mrb[86].mxu1  ;;  %v2291_v18 = vpack.c.bf16 %v2276_v19, %v2275_v4 }
 0x5f3   : > { %v2265_v47 = vadd.f32 %v4310_v58, %v2242_v5  ;;  %v2243_v7 = vmul.f32 %v3159_v16, %v4305_v2  ;;  %v2185_v24 = vpop.f32.mrb[87].mxu1 }
 0x5f4   : > { %v2263_v25 = vadd.f32 %v4310_v58, %v2240_v13  ;;  %v2241_v15 = vmul.f32 %v4305_v2, %v2185_v24  ;;  %3184 = vmatprep.mubr.bf16.mxu0 %v2291_v18 }
 0x5f5   : > { %v2266_v17 = vadd.f32 %v4310_v58, %v2243_v7  ;;  %3185 = vmatmul.mubr.bf16.vlgmr.msra.gmra.mrb[96].mxu0 %v2292_v14  ;;  %v2281_v55 = vadd.f32 %v2265_v47, %v4139_v43 }
 0x5f6   : > { %v2264_v10 = vadd.f32 %v4310_v58, %v2241_v15  ;;  %v2279_v6 = vadd.f32 %v2263_v25, %v4130_v34 }
 0x5f7   : > { %v2282_v3 = vadd.f32 %v2266_v17, %v4142_v44 }
 0x5f8   : > { %v2280_v31 = vadd.f32 %v2264_v10, %v4133_v35  ;;  %v3162_v36 = vpop.f32.mrb[88].mxu1 }
 0x5f9   : > { %v2246_v37 = vmul.f32 %v3162_v36, %v4305_v2  ;;  %v2198_v38 = vpop.f32.mrb[89].mxu1  ;;  %v2294_v28 = vpack.c.bf16 %v2282_v3, %v2281_v55 }
 0x5fa   : > { %v2244_v40 = vmul.f32 %v4305_v2, %v2198_v38  ;;  %v3163_v42 = vpop.f32.mrb[90].mxu1  ;;  %v2293_v30 = vpack.c.bf16 %v2280_v31, %v2279_v6 }
 0x5fb   : > { %v2269_v39 = vadd.f32 %v4310_v58, %v2246_v37  ;;  %v2247_v48 = vmul.f32 %v3163_v42, %v4305_v2  ;;  %v2201_v43 = vpop.f32.mrb[91].mxu1 }
 0x5fc   : > { %v2267_v44 = vadd.f32 %v4310_v58, %v2244_v40  ;;  %v2245_v34 = vmul.f32 %v4305_v2, %v2201_v43  ;;  %3188 = vmatprep.mubr.bf16.mxu0 %v2293_v30 }
 0x5fd   : > { %v2270_v35 = vadd.f32 %v4310_v58, %v2247_v48  ;;  %3189 = vmatmul.mubr.bf16.gmra.mrb[100].mxu0 %v2294_v28  ;;  %v2285_v56 = vadd.f32 %v2269_v39, %v4157_v63 }
 0x5fe   : > { %v2268_v51 = vadd.f32 %v4310_v58, %v2245_v34  ;;  %v2283_v62 = vadd.f32 %v2267_v44, %v4148_v52 }
 0x5ff   : > { %v2286_v57 = vadd.f32 %v2270_v35, %v4160_v0 }
 0x600   : > { %v2284_v11 = vadd.f32 %v2268_v51, %v4151_v53  ;;  %v3166_v46 = vpop.f32.mrb[92].mxu1 }
 0x601   : > { %v2296_v54 = vpack.c.bf16 %v2286_v57, %v2285_v56  ;;  %v2250_v32 = vmul.f32 %v3166_v46, %v4305_v2  ;;  %v2214_v50 = vpop.f32.mrb[93].mxu1 }
 0x602   : > { %v2248_v27 = vmul.f32 %v4305_v2, %v2214_v50  ;;  %v3167_v23 = vpop.f32.mrb[94].mxu1  ;;  %v2295_v45 = vpack.c.bf16 %v2284_v11, %v2283_v62 }
 0x603   : > { %v2273_v60 = vadd.f32 %v4310_v58, %v2250_v32  ;;  %v2251_v61 = vmul.f32 %v3167_v23, %v4305_v2  ;;  %v2217_v63 = vpop.f32.mrb[95].mxu1 }
 0x604   : > { %v2271_v0 = vadd.f32 %v4310_v58, %v2248_v27  ;;  %v2249_v52 = vmul.f32 %v4305_v2, %v2217_v63  ;;  %3192 = vmatprep.mubr.bf16.mxu1 %v2295_v45  ;;  %v2753_v2 = vld [vmem:[%s4472_s29] ss:$0 sm:$0xff] }
 0x605   : > { %v2274_v53 = vadd.f32 %v4310_v58, %v2251_v61  ;;  %3193 = vmatmul.mubr.bf16.vlgmr.msra.gmra.mrb[96].mxu1 %v2296_v54  ;;  %v2289_v29 = vadd.f32 %v2273_v60, %v4175_v20 }
 0x606   : > { %v2272_v1 = vadd.f32 %v4310_v58, %v2249_v52  ;;  %v2287_v26 = vadd.f32 %v2271_v0, %v4166_v9 }
 0x607   : > { %v2290_v22 = vadd.f32 %v2274_v53, %v4178_v21 }
 0x608   : > { %v2288_v41 = vadd.f32 %v2272_v1, %v4169_v12 }
 0x609   : > { %v2298_v49 = vpack.c.bf16 %v2290_v22, %v2289_v29 }
 0x60a   : > { %v2297_v59 = vpack.c.bf16 %v2288_v41, %v2287_v26 }
 0x60c   : > { %3196 = vmatprep.mubr.bf16.mxu1 %v2297_v59 }
 0x60d   : > { %3197 = vmatmul.mubr.bf16.gmra.mrb[100].mxu1 %v2298_v49 }
 0x6c8   : > { %v3186_v4 = vpop.f32.mrb[96].mxu0 }
 0x6c9   : > { %v2413_v19 = vadd.f32 %v3186_v4, %v2753_v2  ;;  %v2404_v58 = vpop.f32.mrb[97].mxu0 }
 0x6ca   : > { %v2405_v33 = vadd.f32 %v2753_v2, %v2404_v58  ;;  %v3187_v20 = vpop.f32.mrb[98].mxu0 }
 0x6cb   : > { %2469 = vst [vmem:[%s4364_s23 + $0x10] sm:$0xff] %v2413_v19  ;;  %v2416_v9 = vadd.f32 %v3187_v20, %v2753_v2  ;;  %v2407_v12 = vpop.f32.mrb[99].mxu0 }
 0x6cc   : > { %2467 = vst [vmem:[%s4364_s23] sm:$0xff] %v2405_v33  ;;  %v2408_v21 = vadd.f32 %v2753_v2, %v2407_v12 }
 0x6cd   : > { %2470 = vst [vmem:[%s4364_s23 + $0x18] sm:$0xff] %v2416_v9 }
 0x6ce   : > { %2468 = vst [vmem:[%s4364_s23 + $0x8] sm:$0xff] %v2408_v21 }
 0x6d0   : > { %v3190_v14 = vpop.f32.mrb[100].mxu0 }
 0x6d1   : > { %v2429_v5 = vadd.f32 %v3190_v14, %v2753_v2  ;;  %v2420_v8 = vpop.f32.mrb[101].mxu0 }
 0x6d2   : > { %v2421_v13 = vadd.f32 %v2753_v2, %v2420_v8  ;;  %v3191_v16 = vpop.f32.mrb[102].mxu0 }
 0x6d3   : > { %2473 = vst [vmem:[%s4364_s23 + $0x30] sm:$0xff] %v2429_v5  ;;  %v2432_v18 = vadd.f32 %v3191_v16, %v2753_v2  ;;  %v2423_v47 = vpop.f32.mrb[103].mxu0 }
 0x6d4   : > { %2471 = vst [vmem:[%s4364_s23 + $0x20] sm:$0xff] %v2421_v13  ;;  %v2424_v7 = vadd.f32 %v2753_v2, %v2423_v47 }
 0x6d5   : > { %2474 = vst [vmem:[%s4364_s23 + $0x38] sm:$0xff] %v2432_v18 }
 0x6d6   : > { %2472 = vst [vmem:[%s4364_s23 + $0x28] sm:$0xff] %v2424_v7 }
 0x6d8   : > { %v3194_v24 = vpop.f32.mrb[96].mxu1 }
 0x6d9   : > { %v2445_v25 = vadd.f32 %v3194_v24, %v2753_v2  ;;  %v2436_v15 = vpop.f32.mrb[97].mxu1 }
 0x6da   : > { %v2437_v17 = vadd.f32 %v2753_v2, %v2436_v15  ;;  %v3195_v10 = vpop.f32.mrb[98].mxu1 }
 0x6db   : > { %2477 = vst [vmem:[%s4364_s23 + $0x50] sm:$0xff] %v2445_v25  ;;  %v2448_v55 = vadd.f32 %v3195_v10, %v2753_v2  ;;  %v2439_v3 = vpop.f32.mrb[99].mxu1 }
 0x6dc   : > { %2475 = vst [vmem:[%s4364_s23 + $0x40] sm:$0xff] %v2437_v17  ;;  %v2440_v6 = vadd.f32 %v2753_v2, %v2439_v3 }
 0x6dd   : > { %2478 = vst [vmem:[%s4364_s23 + $0x58] sm:$0xff] %v2448_v55 }
 0x6de   : > { %2476 = vst [vmem:[%s4364_s23 + $0x48] sm:$0xff] %v2440_v6 }
 0x6e0   : > { %v3198_v31 = vpop.f32.mrb[100].mxu1 }
 0x6e1   : > { %v2461_v36 = vadd.f32 %v3198_v31, %v2753_v2  ;;  %v2452_v37 = vpop.f32.mrb[101].mxu1 }
 0x6e2   : > { %v2453_v38 = vadd.f32 %v2753_v2, %v2452_v37  ;;  %v3199_v28 = vpop.f32.mrb[102].mxu1 }
 0x6e3   : > { %2481 = vst [vmem:[%s4364_s23 + $0x70] sm:$0xff] %v2461_v36  ;;  %v2464_v40 = vadd.f32 %v3199_v28, %v2753_v2  ;;  %v2455_v42 = vpop.f32.mrb[103].mxu1 }
 0x6e4   : > { %2479 = vst [vmem:[%s4364_s23 + $0x60] sm:$0xff] %v2453_v38  ;;  %v2456_v30 = vadd.f32 %v2753_v2, %v2455_v42 }
 0x6e5   : > { %2482 = vst [vmem:[%s4364_s23 + $0x78] sm:$0xff] %v2464_v40 }
 0x6e6   : > { %2480 = vst [vmem:[%s4364_s23 + $0x68] sm:$0xff] %v2456_v30 }
 0x6e7   : > { %3638 = shalt.err (!%p3635_p13)
}
 0x6e8   : > { %s3639_s11 = scalar_lea.hbm %s4384_s9, 2048  ;;  %s3643_s23 = scalar_lea.hbm %s4473_s28, 4096 }
 0x6e9   : > { %p3640_p9 = scmp.ne.s32.totalorder %s4384_s9, %s3639_s11  ;;  %p3644_p4 = scmp.lt.u32.totalorder %s4384_s9, %s4473_s28 }
 0x6ea   : > { %p3645_p8 = scmp.lt.u32.totalorder %s3643_s23, %s3639_s11  ;;  %p3647_p3 = scmp.lt.u32.totalorder %s3639_s11, %s4384_s9 }
 0x6eb   : > { %p3641_p0 = pnand %p3640_p9, %p3939_p10 }
 0x6ec   : > { %p3646_p6 = por %p3645_p8, %p3644_p4 }
 0x6ed   : > { %p3642_p11 = pneg %p3641_p0 }
 0x6ee   : > { %p3648_p5 = por %p3647_p3, %p3646_p6 }
 0x6f0   : > { %p3649_p7 = pnand %p3648_p5, %p3642_p11 }
 0x6f2   : > { %3652 = shalt.err (!%p3649_p7)
}
 0x6f3   : > { %s3714_s27 = smov 128   ;;  %s3715_s30 = smov 8  }
 0x6f4   : > { %3237 = dma.vmem_to_hbm [thread:$0]  (%p3939_p10), %s4386_s19, 2048, %s4384_s9, %s2484_s17, %s3714_s27, %s3714_s27, %s3715_s30  }
 0x6f5 PF: > { %s4474_s25 = sld [smem:[#allocation16_spill]]  ;;  %s4475_s26 = sld [smem:[#allocation17_spill]] }
 0x6f6   : > { %p4477_p1 = scmp.ge.s32.totalorder %s3699_s16, 2 }
 0x6fb   : > { %s2512_s24 = sand.u32 1, %s4474_s25   ;;  %p4476_p12 = scmp.ne.s32.totalorder %s4475_s26, 0 }
 0x6fc   : > { %s2513_s11 = scalar_lea.sflag [#allocation4], %s2512_s24 }
 0x6fd   : > { %p3257_p2 = pnand %p4477_p1, %p4476_p12 }
 0x6ff   : > { %3682 = dma.done.wait (!%p3257_p2), %s2513_s11, 2048  }
 0x700   : > { %3684 = vsyncadd (!%p3257_p2), %s2513_s11, 4294965248  ;;  %p25_p13 = scmp.ge.s32.totalorder %s3929_s22, 4   ;;  %s4478_s13 = smov %s3691_s14 }
 0x701   : > { %s4479_s14 = smov %s3695_s15  ;;  %s4480_s15 = smov %s3945_s20 }
 0x702   : > { %s4481_s16 = smov %s3929_s22  ;;  %27 = sbr.rel (!%p25_p13) target bundleno = 10 (0xa), region = 121 }
 0x709   :  { %2518 = vsyncpa [#allocation3], 1 }
 0x70a   :  { %2520 = vsyncpa [#allocation3 + $0x1], 1 }
 0x70b   :  { %2521 = vsyncpa [#allocation6], 1 }
 0x70c   :  { %2522 = vsyncpa [#allocation9], 1 }
 0x70d   :  { %2523 = vsyncpa [#allocation4], 1 }
 0x70e   :  { %2525 = vsyncpa [#allocation4 + $0x1], 1 }

</bundles_post_ra>
